<compile_context>
chip_gen: v5e
topology: v5e:2x2
jax: 0.10.0
libtpu: 0.0.40
codegen_flags: <defaults>
</compile_context>

<pallas_src>
import jax
import jax.numpy as jnp
from jax.experimental import pallas as pl
from jax.experimental.pallas import tpu as pltpu

LANE = 128      # lane width (last dim)
SUBLANE = 8     # sublane tile (second-to-last dim)
MAX_B_TILE = 256


def _round_up(n, m):
    return (n + m - 1) // m * m


def _batch_tiling(batch):
    """Pick (batch_tile, padded_batch).

    Large tiles fill the MXU M dimension; when the batch permits, use >= 2 grid
    tiles so the "parallel" grid axis can shard across TensorCores (v7x megacore).
    """
    bp_min = _round_up(max(batch, SUBLANE), SUBLANE)
    if bp_min <= SUBLANE:
        tile = SUBLANE
    else:
        tile = min(MAX_B_TILE, _round_up((bp_min + 1) // 2, SUBLANE))
    return tile, _round_up(bp_min, tile)


def _rnn_block_kernel(x_ref, wi1_ref, wh1_ref, b1_ref, wi2_ref, wh2_ref, b2_ref,
                      out_ref, xw1_scr, xw2_scr):
    """Fused 2-layer forward RNN for one batch tile.  All refs time-major & padded.

    x_ref   : (S, Bt, Dp)  input tile (time-major)
    wi1_ref : (Dp, Hp)     layer-1 i2h weight, pre-transposed to (in, out)
    wh1_ref : (Hp, Hp)     layer-1 h2h weight
    b1_ref  : (1, Hp)      layer-1 folded bias (b_i2h + b_h2h)
    wi2_ref / wh2_ref / b2_ref : layer-2 equivalents
    out_ref : (S, Bt, Hp)  layer-2 hidden states (time-major)
    xw1_scr / xw2_scr : (S, Bt, Hp) VMEM scratch for the hoisted input projections
    """
    S, Bt, Dp = x_ref.shape
    Hp = wh1_ref.shape[0]

    # ---- Layer-1 input projection for ALL timesteps: one big MXU GEMM, staged in
    # VMEM scratch so the time loop only ever holds one (Bt, Hp) slice in vregs.
    xw1_scr[...] = (
        jnp.dot(x_ref[...].reshape(S * Bt, Dp), wi1_ref[...],
                preferred_element_type=jnp.float32)
        + b1_ref[...]
    ).reshape(S, Bt, Hp)

    wh1 = wh1_ref[...]
    wi2 = wi2_ref[...]
    b2 = b2_ref[...]
    wh2 = wh2_ref[...]

    # ---- Layer-1 recurrence.  Only h @ W_h2h + tanh sits on the serial chain; the
    # independent layer-2 input projection of h1_t is interleaved so the MXU stays
    # busy while the dependent chain drains.  S is a small compile-time constant, so
    # the loop is statically unrolled (full LLO scheduler visibility); live ranges
    # stay bounded because the xw slices live in scratch, not vregs.
    # TODO(synk): for very long S, chunk the time axis / switch to lax.fori_loop and
    # stage W_h2h in the MXU explicitly (pltpu.matmul_push_rhs) to avoid RHS re-push.
    h = jnp.zeros((Bt, Hp), jnp.float32)
    for t in range(S):
        h = jnp.tanh(xw1_scr[t]
                     + jnp.dot(h, wh1, preferred_element_type=jnp.float32))
        xw2_scr[t] = jnp.dot(h, wi2, preferred_element_type=jnp.float32) + b2

    # ---- Layer-2 recurrence.  The original RNNBlock seeds layer 2 with layer-1's
    # final hidden state, so `h` carries over (NOT reset to zero).
    for t in range(S):
        h = jnp.tanh(xw2_scr[t]
                     + jnp.dot(h, wh2, preferred_element_type=jnp.float32))
        out_ref[t] = h


def _resident(shape):
    """Whole-array block with a constant index_map: fetched once, VMEM-resident."""
    return pl.BlockSpec(shape, lambda b: (0,) * len(shape))


def rnn_block_pallas(x, params):
    """x: (B, S, D) float32, batch-major (same as the PyTorch module).

    params: [(W_i2h^T (D,H), b_i2h (1,H), W_h2h^T (H,H), b_h2h (1,H)),   # layer 1
             (W_i2h^T (H,H), b_i2h (1,H), W_h2h^T (H,H), b_h2h (1,H))]   # layer 2
    Returns (out (B, S, H), h_T (B, H)) — identical to RNNBlock.forward.
    """
    (wi1, bi1, wh1, bh1), (wi2, bi2, wh2, bh2) = params
    B, S, D = x.shape
    H = wh1.shape[0]

    bt, Bp = _batch_tiling(B)
    Dp = _round_up(D, LANE)
    Hp = _round_up(H, LANE)

    # Time-major kernel layout; zero-pad batch to the tile and feature dims to the
    # 128-lane width.  Zero padding does not perturb real rows/lanes.
    xp = jnp.zeros((S, Bp, Dp), jnp.float32).at[:, :B, :D].set(
        jnp.transpose(x, (1, 0, 2)))
    wi1p = jnp.zeros((Dp, Hp), jnp.float32).at[:D, :H].set(wi1)
    wh1p = jnp.zeros((Hp, Hp), jnp.float32).at[:H, :H].set(wh1)
    b1p = jnp.zeros((1, Hp), jnp.float32).at[:, :H].set(bi1 + bh1)   # folded bias
    wi2p = jnp.zeros((Hp, Hp), jnp.float32).at[:H, :H].set(wi2)
    wh2p = jnp.zeros((Hp, Hp), jnp.float32).at[:H, :H].set(wh2)
    b2p = jnp.zeros((1, Hp), jnp.float32).at[:, :H].set(bi2 + bh2)   # folded bias

    grid = (Bp // bt,)   # batch is the embarrassingly-parallel axis

    # Explicit VMEM budget: resident weights + double-buffered x/out tiles + the xw
    # scratch, with 2x headroom, clamped to [16 MiB, 100 MiB].
    weights_bytes = 4 * (Dp * Hp + 3 * Hp * Hp + 2 * Hp)
    io_bytes = 4 * 2 * S * bt * (Dp + Hp)
    scratch_bytes = 4 * 2 * S * bt * Hp
    vmem_budget = int(min(100 * 2**20,
                          max(16 * 2**20,
                              2 * (weights_bytes + io_bytes + scratch_bytes))))

    cost = pl.CostEstimate(
        flops=2 * B * S * (D * H + 3 * H * H),
        transcendentals=2 * B * S * H,
        bytes_accessed=4 * (B * S * D + B * S * H + D * H + 3 * H * H + 4 * H),
    )

    out_tm = pl.pallas_call(
        _rnn_block_kernel,
        out_shape=jax.ShapeDtypeStruct((S, Bp, Hp), jnp.float32),
        grid_spec=pltpu.PrefetchScalarGridSpec(
            num_scalar_prefetch=0,
            grid=grid,
            in_specs=[
                pl.BlockSpec((S, bt, Dp), lambda b: (0, b, 0)),   # x tile, time-major
                _resident((Dp, Hp)),   # W_i2h layer 1
                _resident((Hp, Hp)),   # W_h2h layer 1
                _resident((1, Hp)),    # folded bias layer 1
                _resident((Hp, Hp)),   # W_i2h layer 2
                _resident((Hp, Hp)),   # W_h2h layer 2
                _resident((1, Hp)),    # folded bias layer 2
            ],
            out_specs=pl.BlockSpec((S, bt, Hp), lambda b: (0, b, 0)),
            scratch_shapes=[pltpu.VMEM((S, bt, Hp), jnp.float32),    # xw1 staging
                            pltpu.VMEM((S, bt, Hp), jnp.float32)],   # xw2 staging
        ),
        compiler_params=pltpu.CompilerParams(
            dimension_semantics=("parallel",),
            vmem_limit_bytes=vmem_budget),
        cost_estimate=cost,
    )(xp, wi1p, wh1p, b1p, wi2p, wh2p, b2p)

    out = jnp.transpose(out_tm[:, :B, :H], (1, 0, 2))   # back to (B, S, H)
    h_T = out[:, -1, :]                                 # layer-2 final hidden state
    return out, h_T


def init_rnn_block_params(key, input_size, hidden_size, n_layers=2):
    """PyTorch-Linear-like uniform(-1/sqrt(fan_in)) init.

    Returns a list of (W_i2h^T (in,H), b_i2h (1,H), W_h2h^T (H,H), b_h2h (1,H)).
    Only forward-direction weights: modes=None skips the backward path entirely.
    """
    params = []
    in_dim = input_size
    for _ in range(n_layers):
        key, k1, k2, k3, k4 = jax.random.split(key, 5)
        bi = 1.0 / jnp.sqrt(jnp.float32(in_dim))
        bh = 1.0 / jnp.sqrt(jnp.float32(hidden_size))
        w_i2h_t = jax.random.uniform(k1, (in_dim, hidden_size), jnp.float32, -bi, bi)
        b_i2h = jax.random.uniform(k2, (1, hidden_size), jnp.float32, -bi, bi)
        w_h2h_t = jax.random.uniform(k3, (hidden_size, hidden_size), jnp.float32, -bh, bh)
        b_h2h = jax.random.uniform(k4, (1, hidden_size), jnp.float32, -bh, bh)
        params.append((w_i2h_t, b_i2h, w_h2h_t, b_h2h))
        in_dim = hidden_size
    return params


def _reference_forward(x, params):
    """Pure-JAX reference mirroring the PyTorch loops (for correctness check)."""
    B, S, _ = x.shape
    H = params[0][2].shape[0]
    hidden = jnp.zeros((B, H), jnp.float32)
    out = x
    for (wi_t, bi, wh_t, bh) in params:
        h = hidden
        outs = []
        for t in range(S):
            h = jnp.tanh(out[:, t, :] @ wi_t + bi + h @ wh_t + bh)
            outs.append(h)
        out = jnp.stack(outs, axis=1)
        hidden = h
    return out, hidden


if __name__ == "__main__":
    # Small shapes consistent with the module's forward: (batch, seq, embed).
    batch, seq, input_size, hidden_size, n_layers = 2, 8, 16, 32, 2

    key = jax.random.PRNGKey(0)
    key_x, key_p = jax.random.split(key)
    x = jax.random.normal(key_x, (batch, seq, input_size), jnp.float32)
    params = init_rnn_block_params(key_p, input_size, hidden_size, n_layers)

    fwd = jax.jit(rnn_block_pallas)
    out, h_final = fwd(x, params)
    out = jax.block_until_ready(out)
    h_final = jax.block_until_ready(h_final)

    # Correctness check against a pure-JAX port of the PyTorch semantics.
    ref_out, ref_h = _reference_forward(x, params)
    assert out.shape == (batch, seq, hidden_size)
    assert h_final.shape == (batch, hidden_size)
    assert jnp.allclose(out, ref_out, atol=1e-5, rtol=1e-5), \
        float(jnp.max(jnp.abs(out - ref_out)))
    assert jnp.allclose(h_final, ref_h, atol=1e-5, rtol=1e-5), \
        float(jnp.max(jnp.abs(h_final - ref_h)))

    print("KERNEL_OK")
</pallas_src>

<mosaic_0001>
module attributes {stable_mosaic.version = 11 : i64} {
  func.func @_rnn_block_kernel(%arg0: i32, %arg1: memref<8x8x128xf32, #tpu.memory_space<vmem>>, %arg2: memref<128x128xf32, #tpu.memory_space<vmem>>, %arg3: memref<128x128xf32, #tpu.memory_space<vmem>>, %arg4: memref<1x128xf32, #tpu.memory_space<vmem>>, %arg5: memref<128x128xf32, #tpu.memory_space<vmem>>, %arg6: memref<128x128xf32, #tpu.memory_space<vmem>>, %arg7: memref<1x128xf32, #tpu.memory_space<vmem>>, %arg8: memref<8x8x128xf32, #tpu.memory_space<vmem>>, %arg9: memref<8x8x128xf32, #tpu.memory_space<vmem>>, %arg10: memref<8x8x128xf32, #tpu.memory_space<vmem>>) attributes {dimension_semantics = [#tpu.dimension_semantics<parallel>], iteration_bounds = array<i64: 1>, scalar_prefetch = 0 : i64, scratch_operands = 2 : i64, tpu.core_type = #tpu.core_type<tc>, window_params = [{transform_indices = @transform_0, window_bounds = array<i64: 8, 8, 128>}, {pipeline_mode = #tpu.pipeline_mode<synchronous>, transform_indices = @transform_1, window_bounds = array<i64: 128, 128>}, {pipeline_mode = #tpu.pipeline_mode<synchronous>, transform_indices = @transform_2, window_bounds = array<i64: 128, 128>}, {pipeline_mode = #tpu.pipeline_mode<synchronous>, transform_indices = @transform_3, window_bounds = array<i64: 1, 128>}, {pipeline_mode = #tpu.pipeline_mode<synchronous>, transform_indices = @transform_4, window_bounds = array<i64: 128, 128>}, {pipeline_mode = #tpu.pipeline_mode<synchronous>, transform_indices = @transform_5, window_bounds = array<i64: 128, 128>}, {pipeline_mode = #tpu.pipeline_mode<synchronous>, transform_indices = @transform_6, window_bounds = array<i64: 1, 128>}, {transform_indices = @transform_7, window_bounds = array<i64: 8, 8, 128>}]} {
    %c0 = arith.constant 0 : index
    %c0_0 = arith.constant 0 : index
    %c0_1 = arith.constant 0 : index
    %0 = vector.load %arg1[%c0, %c0_0, %c0_1] : memref<8x8x128xf32, #tpu.memory_space<vmem>>, vector<8x8x128xf32>
    %1 = vector.shape_cast %0 : vector<8x8x128xf32> to vector<64x128xf32>
    %c0_2 = arith.constant 0 : index
    %c0_3 = arith.constant 0 : index
    %2 = vector.load %arg2[%c0_2, %c0_3] : memref<128x128xf32, #tpu.memory_space<vmem>>, vector<128x128xf32>
    %cst = arith.constant dense<0.000000e+00> : vector<64x128xf32>
    %3 = tpu.matmul %1, %2, %cst {dimension_numbers = #tpu.dot_dimension_numbers<[1], [0], [0], [1], [0, 0, 1, 1], [], []>} : vector<64x128xf32>, vector<128x128xf32>, vector<64x128xf32> -> vector<64x128xf32>
    %c0_4 = arith.constant 0 : index
    %c0_5 = arith.constant 0 : index
    %4 = vector.load %arg4[%c0_4, %c0_5] : memref<1x128xf32, #tpu.memory_space<vmem>>, vector<1x128xf32>
    %5 = vector.broadcast %4 : vector<1x128xf32> to vector<64x128xf32>
    %6 = arith.addf %3, %5 : vector<64x128xf32>
    %7 = vector.shape_cast %6 : vector<64x128xf32> to vector<8x8x128xf32>
    %c0_6 = arith.constant 0 : index
    %c0_7 = arith.constant 0 : index
    %c0_8 = arith.constant 0 : index
    %8 = vector.load %arg9[%c0_6, %c0_7, %c0_8] : memref<8x8x128xf32, #tpu.memory_space<vmem>>, vector<8x8x128xf32>
    tpu.vector_store %arg9[%c0_6, %c0_7, %c0_8], %7 {strides = array<i32>} : memref<8x8x128xf32, #tpu.memory_space<vmem>>, vector<8x8x128xf32>,
    %c0_9 = arith.constant 0 : index
    %c0_10 = arith.constant 0 : index
    %9 = vector.load %arg3[%c0_9, %c0_10] : memref<128x128xf32, #tpu.memory_space<vmem>>, vector<128x128xf32>
    %c0_11 = arith.constant 0 : index
    %c0_12 = arith.constant 0 : index
    %10 = vector.load %arg5[%c0_11, %c0_12] : memref<128x128xf32, #tpu.memory_space<vmem>>, vector<128x128xf32>
    %c0_13 = arith.constant 0 : index
    %c0_14 = arith.constant 0 : index
    %11 = vector.load %arg7[%c0_13, %c0_14] : memref<1x128xf32, #tpu.memory_space<vmem>>, vector<1x128xf32>
    %c0_15 = arith.constant 0 : index
    %c0_16 = arith.constant 0 : index
    %12 = vector.load %arg6[%c0_15, %c0_16] : memref<128x128xf32, #tpu.memory_space<vmem>>, vector<128x128xf32>
    %cst_17 = arith.constant 0.000000e+00 : f32
    %13 = vector.broadcast %cst_17 : f32 to vector<8x128xf32>
    %c0_18 = arith.constant 0 : index
    %c0_19 = arith.constant 0 : index
    %c0_20 = arith.constant 0 : index
    %14 = vector.load %arg9[%c0_18, %c0_19, %c0_20] : memref<8x8x128xf32, #tpu.memory_space<vmem>>, vector<1x8x128xf32>
    %15 = vector.shape_cast %14 : vector<1x8x128xf32> to vector<8x128xf32>
    %cst_21 = arith.constant dense<0.000000e+00> : vector<8x128xf32>
    %16 = tpu.matmul %13, %9, %cst_21 {dimension_numbers = #tpu.dot_dimension_numbers<[1], [0], [0], [1], [0, 0, 1, 1], [], []>} : vector<8x128xf32>, vector<128x128xf32>, vector<8x128xf32> -> vector<8x128xf32>
    %17 = arith.addf %15, %16 : vector<8x128xf32>
    %18 = math.tanh %17 : vector<8x128xf32>
    %cst_22 = arith.constant dense<0.000000e+00> : vector<8x128xf32>
    %19 = tpu.matmul %18, %10, %cst_22 {dimension_numbers = #tpu.dot_dimension_numbers<[1], [0], [0], [1], [0, 0, 1, 1], [], []>} : vector<8x128xf32>, vector<128x128xf32>, vector<8x128xf32> -> vector<8x128xf32>
    %20 = vector.broadcast %11 : vector<1x128xf32> to vector<8x128xf32>
    %21 = arith.addf %19, %20 : vector<8x128xf32>
    %c0_23 = arith.constant 0 : index
    %c0_24 = arith.constant 0 : index
    %c0_25 = arith.constant 0 : index
    %22 = vector.load %arg10[%c0_23, %c0_24, %c0_25] : memref<8x8x128xf32, #tpu.memory_space<vmem>>, vector<1x8x128xf32>
    %23 = vector.shape_cast %22 : vector<1x8x128xf32> to vector<8x128xf32>
    %24 = vector.shape_cast %21 : vector<8x128xf32> to vector<1x8x128xf32>
    tpu.vector_store %arg10[%c0_23, %c0_24, %c0_25], %24 {strides = array<i32>} : memref<8x8x128xf32, #tpu.memory_space<vmem>>, vector<1x8x128xf32>,
    %c1 = arith.constant 1 : index
    %c0_26 = arith.constant 0 : index
    %c0_27 = arith.constant 0 : index
    %25 = vector.load %arg9[%c1, %c0_26, %c0_27] : memref<8x8x128xf32, #tpu.memory_space<vmem>>, vector<1x8x128xf32>
    %26 = vector.shape_cast %25 : vector<1x8x128xf32> to vector<8x128xf32>
    %cst_28 = arith.constant dense<0.000000e+00> : vector<8x128xf32>
    %27 = tpu.matmul %18, %9, %cst_28 {dimension_numbers = #tpu.dot_dimension_numbers<[1], [0], [0], [1], [0, 0, 1, 1], [], []>} : vector<8x128xf32>, vector<128x128xf32>, vector<8x128xf32> -> vector<8x128xf32>
    %28 = arith.addf %26, %27 : vector<8x128xf32>
    %29 = math.tanh %28 : vector<8x128xf32>
    %cst_29 = arith.constant dense<0.000000e+00> : vector<8x128xf32>
    %30 = tpu.matmul %29, %10, %cst_29 {dimension_numbers = #tpu.dot_dimension_numbers<[1], [0], [0], [1], [0, 0, 1, 1], [], []>} : vector<8x128xf32>, vector<128x128xf32>, vector<8x128xf32> -> vector<8x128xf32>
    %31 = vector.broadcast %11 : vector<1x128xf32> to vector<8x128xf32>
    %32 = arith.addf %30, %31 : vector<8x128xf32>
    %c1_30 = arith.constant 1 : index
    %c0_31 = arith.constant 0 : index
    %c0_32 = arith.constant 0 : index
    %33 = vector.load %arg10[%c1_30, %c0_31, %c0_32] : memref<8x8x128xf32, #tpu.memory_space<vmem>>, vector<1x8x128xf32>
    %34 = vector.shape_cast %33 : vector<1x8x128xf32> to vector<8x128xf32>
    %35 = vector.shape_cast %32 : vector<8x128xf32> to vector<1x8x128xf32>
    tpu.vector_store %arg10[%c1_30, %c0_31, %c0_32], %35 {strides = array<i32>} : memref<8x8x128xf32, #tpu.memory_space<vmem>>, vector<1x8x128xf32>,
    %c2 = arith.constant 2 : index
    %c0_33 = arith.constant 0 : index
    %c0_34 = arith.constant 0 : index
    %36 = vector.load %arg9[%c2, %c0_33, %c0_34] : memref<8x8x128xf32, #tpu.memory_space<vmem>>, vector<1x8x128xf32>
    %37 = vector.shape_cast %36 : vector<1x8x128xf32> to vector<8x128xf32>
    %cst_35 = arith.constant dense<0.000000e+00> : vector<8x128xf32>
    %38 = tpu.matmul %29, %9, %cst_35 {dimension_numbers = #tpu.dot_dimension_numbers<[1], [0], [0], [1], [0, 0, 1, 1], [], []>} : vector<8x128xf32>, vector<128x128xf32>, vector<8x128xf32> -> vector<8x128xf32>
    %39 = arith.addf %37, %38 : vector<8x128xf32>
    %40 = math.tanh %39 : vector<8x128xf32>
    %cst_36 = arith.constant dense<0.000000e+00> : vector<8x128xf32>
    %41 = tpu.matmul %40, %10, %cst_36 {dimension_numbers = #tpu.dot_dimension_numbers<[1], [0], [0], [1], [0, 0, 1, 1], [], []>} : vector<8x128xf32>, vector<128x128xf32>, vector<8x128xf32> -> vector<8x128xf32>
    %42 = vector.broadcast %11 : vector<1x128xf32> to vector<8x128xf32>
    %43 = arith.addf %41, %42 : vector<8x128xf32>
    %c2_37 = arith.constant 2 : index
    %c0_38 = arith.constant 0 : index
    %c0_39 = arith.constant 0 : index
    %44 = vector.load %arg10[%c2_37, %c0_38, %c0_39] : memref<8x8x128xf32, #tpu.memory_space<vmem>>, vector<1x8x128xf32>
    %45 = vector.shape_cast %44 : vector<1x8x128xf32> to vector<8x128xf32>
    %46 = vector.shape_cast %43 : vector<8x128xf32> to vector<1x8x128xf32>
    tpu.vector_store %arg10[%c2_37, %c0_38, %c0_39], %46 {strides = array<i32>} : memref<8x8x128xf32, #tpu.memory_space<vmem>>, vector<1x8x128xf32>,
    %c3 = arith.constant 3 : index
    %c0_40 = arith.constant 0 : index
    %c0_41 = arith.constant 0 : index
    %47 = vector.load %arg9[%c3, %c0_40, %c0_41] : memref<8x8x128xf32, #tpu.memory_space<vmem>>, vector<1x8x128xf32>
    %48 = vector.shape_cast %47 : vector<1x8x128xf32> to vector<8x128xf32>
    %cst_42 = arith.constant dense<0.000000e+00> : vector<8x128xf32>
    %49 = tpu.matmul %40, %9, %cst_42 {dimension_numbers = #tpu.dot_dimension_numbers<[1], [0], [0], [1], [0, 0, 1, 1], [], []>} : vector<8x128xf32>, vector<128x128xf32>, vector<8x128xf32> -> vector<8x128xf32>
    %50 = arith.addf %48, %49 : vector<8x128xf32>
    %51 = math.tanh %50 : vector<8x128xf32>
    %cst_43 = arith.constant dense<0.000000e+00> : vector<8x128xf32>
    %52 = tpu.matmul %51, %10, %cst_43 {dimension_numbers = #tpu.dot_dimension_numbers<[1], [0], [0], [1], [0, 0, 1, 1], [], []>} : vector<8x128xf32>, vector<128x128xf32>, vector<8x128xf32> -> vector<8x128xf32>
    %53 = vector.broadcast %11 : vector<1x128xf32> to vector<8x128xf32>
    %54 = arith.addf %52, %53 : vector<8x128xf32>
    %c3_44 = arith.constant 3 : index
    %c0_45 = arith.constant 0 : index
    %c0_46 = arith.constant 0 : index
    %55 = vector.load %arg10[%c3_44, %c0_45, %c0_46] : memref<8x8x128xf32, #tpu.memory_space<vmem>>, vector<1x8x128xf32>
    %56 = vector.shape_cast %55 : vector<1x8x128xf32> to vector<8x128xf32>
    %57 = vector.shape_cast %54 : vector<8x128xf32> to vector<1x8x128xf32>
    tpu.vector_store %arg10[%c3_44, %c0_45, %c0_46], %57 {strides = array<i32>} : memref<8x8x128xf32, #tpu.memory_space<vmem>>, vector<1x8x128xf32>,
    %c4 = arith.constant 4 : index
    %c0_47 = arith.constant 0 : index
    %c0_48 = arith.constant 0 : index
    %58 = vector.load %arg9[%c4, %c0_47, %c0_48] : memref<8x8x128xf32, #tpu.memory_space<vmem>>, vector<1x8x128xf32>
    %59 = vector.shape_cast %58 : vector<1x8x128xf32> to vector<8x128xf32>
    %cst_49 = arith.constant dense<0.000000e+00> : vector<8x128xf32>
    %60 = tpu.matmul %51, %9, %cst_49 {dimension_numbers = #tpu.dot_dimension_numbers<[1], [0], [0], [1], [0, 0, 1, 1], [], []>} : vector<8x128xf32>, vector<128x128xf32>, vector<8x128xf32> -> vector<8x128xf32>
    %61 = arith.addf %59, %60 : vector<8x128xf32>
    %62 = math.tanh %61 : vector<8x128xf32>
    %cst_50 = arith.constant dense<0.000000e+00> : vector<8x128xf32>
    %63 = tpu.matmul %62, %10, %cst_50 {dimension_numbers = #tpu.dot_dimension_numbers<[1], [0], [0], [1], [0, 0, 1, 1], [], []>} : vector<8x128xf32>, vector<128x128xf32>, vector<8x128xf32> -> vector<8x128xf32>
    %64 = vector.broadcast %11 : vector<1x128xf32> to vector<8x128xf32>
    %65 = arith.addf %63, %64 : vector<8x128xf32>
    %c4_51 = arith.constant 4 : index
    %c0_52 = arith.constant 0 : index
    %c0_53 = arith.constant 0 : index
    %66 = vector.load %arg10[%c4_51, %c0_52, %c0_53] : memref<8x8x128xf32, #tpu.memory_space<vmem>>, vector<1x8x128xf32>
    %67 = vector.shape_cast %66 : vector<1x8x128xf32> to vector<8x128xf32>
    %68 = vector.shape_cast %65 : vector<8x128xf32> to vector<1x8x128xf32>
    tpu.vector_store %arg10[%c4_51, %c0_52, %c0_53], %68 {strides = array<i32>} : memref<8x8x128xf32, #tpu.memory_space<vmem>>, vector<1x8x128xf32>,
    %c5 = arith.constant 5 : index
    %c0_54 = arith.constant 0 : index
    %c0_55 = arith.constant 0 : index
    %69 = vector.load %arg9[%c5, %c0_54, %c0_55] : memref<8x8x128xf32, #tpu.memory_space<vmem>>, vector<1x8x128xf32>
    %70 = vector.shape_cast %69 : vector<1x8x128xf32> to vector<8x128xf32>
    %cst_56 = arith.constant dense<0.000000e+00> : vector<8x128xf32>
    %71 = tpu.matmul %62, %9, %cst_56 {dimension_numbers = #tpu.dot_dimension_numbers<[1], [0], [0], [1], [0, 0, 1, 1], [], []>} : vector<8x128xf32>, vector<128x128xf32>, vector<8x128xf32> -> vector<8x128xf32>
    %72 = arith.addf %70, %71 : vector<8x128xf32>
    %73 = math.tanh %72 : vector<8x128xf32>
    %cst_57 = arith.constant dense<0.000000e+00> : vector<8x128xf32>
    %74 = tpu.matmul %73, %10, %cst_57 {dimension_numbers = #tpu.dot_dimension_numbers<[1], [0], [0], [1], [0, 0, 1, 1], [], []>} : vector<8x128xf32>, vector<128x128xf32>, vector<8x128xf32> -> vector<8x128xf32>
    %75 = vector.broadcast %11 : vector<1x128xf32> to vector<8x128xf32>
    %76 = arith.addf %74, %75 : vector<8x128xf32>
    %c5_58 = arith.constant 5 : index
    %c0_59 = arith.constant 0 : index
    %c0_60 = arith.constant 0 : index
    %77 = vector.load %arg10[%c5_58, %c0_59, %c0_60] : memref<8x8x128xf32, #tpu.memory_space<vmem>>, vector<1x8x128xf32>
    %78 = vector.shape_cast %77 : vector<1x8x128xf32> to vector<8x128xf32>
    %79 = vector.shape_cast %76 : vector<8x128xf32> to vector<1x8x128xf32>
    tpu.vector_store %arg10[%c5_58, %c0_59, %c0_60], %79 {strides = array<i32>} : memref<8x8x128xf32, #tpu.memory_space<vmem>>, vector<1x8x128xf32>,
    %c6 = arith.constant 6 : index
    %c0_61 = arith.constant 0 : index
    %c0_62 = arith.constant 0 : index
    %80 = vector.load %arg9[%c6, %c0_61, %c0_62] : memref<8x8x128xf32, #tpu.memory_space<vmem>>, vector<1x8x128xf32>
    %81 = vector.shape_cast %80 : vector<1x8x128xf32> to vector<8x128xf32>
    %cst_63 = arith.constant dense<0.000000e+00> : vector<8x128xf32>
    %82 = tpu.matmul %73, %9, %cst_63 {dimension_numbers = #tpu.dot_dimension_numbers<[1], [0], [0], [1], [0, 0, 1, 1], [], []>} : vector<8x128xf32>, vector<128x128xf32>, vector<8x128xf32> -> vector<8x128xf32>
    %83 = arith.addf %81, %82 : vector<8x128xf32>
    %84 = math.tanh %83 : vector<8x128xf32>
    %cst_64 = arith.constant dense<0.000000e+00> : vector<8x128xf32>
    %85 = tpu.matmul %84, %10, %cst_64 {dimension_numbers = #tpu.dot_dimension_numbers<[1], [0], [0], [1], [0, 0, 1, 1], [], []>} : vector<8x128xf32>, vector<128x128xf32>, vector<8x128xf32> -> vector<8x128xf32>
    %86 = vector.broadcast %11 : vector<1x128xf32> to vector<8x128xf32>
    %87 = arith.addf %85, %86 : vector<8x128xf32>
    %c6_65 = arith.constant 6 : index
    %c0_66 = arith.constant 0 : index
    %c0_67 = arith.constant 0 : index
    %88 = vector.load %arg10[%c6_65, %c0_66, %c0_67] : memref<8x8x128xf32, #tpu.memory_space<vmem>>, vector<1x8x128xf32>
    %89 = vector.shape_cast %88 : vector<1x8x128xf32> to vector<8x128xf32>
    %90 = vector.shape_cast %87 : vector<8x128xf32> to vector<1x8x128xf32>
    tpu.vector_store %arg10[%c6_65, %c0_66, %c0_67], %90 {strides = array<i32>} : memref<8x8x128xf32, #tpu.memory_space<vmem>>, vector<1x8x128xf32>,
    %c7 = arith.constant 7 : index
    %c0_68 = arith.constant 0 : index
    %c0_69 = arith.constant 0 : index
    %91 = vector.load %arg9[%c7, %c0_68, %c0_69] : memref<8x8x128xf32, #tpu.memory_space<vmem>>, vector<1x8x128xf32>
    %92 = vector.shape_cast %91 : vector<1x8x128xf32> to vector<8x128xf32>
    %cst_70 = arith.constant dense<0.000000e+00> : vector<8x128xf32>
    %93 = tpu.matmul %84, %9, %cst_70 {dimension_numbers = #tpu.dot_dimension_numbers<[1], [0], [0], [1], [0, 0, 1, 1], [], []>} : vector<8x128xf32>, vector<128x128xf32>, vector<8x128xf32> -> vector<8x128xf32>
    %94 = arith.addf %92, %93 : vector<8x128xf32>
    %95 = math.tanh %94 : vector<8x128xf32>
    %cst_71 = arith.constant dense<0.000000e+00> : vector<8x128xf32>
    %96 = tpu.matmul %95, %10, %cst_71 {dimension_numbers = #tpu.dot_dimension_numbers<[1], [0], [0], [1], [0, 0, 1, 1], [], []>} : vector<8x128xf32>, vector<128x128xf32>, vector<8x128xf32> -> vector<8x128xf32>
    %97 = vector.broadcast %11 : vector<1x128xf32> to vector<8x128xf32>
    %98 = arith.addf %96, %97 : vector<8x128xf32>
    %c7_72 = arith.constant 7 : index
    %c0_73 = arith.constant 0 : index
    %c0_74 = arith.constant 0 : index
    %99 = vector.load %arg10[%c7_72, %c0_73, %c0_74] : memref<8x8x128xf32, #tpu.memory_space<vmem>>, vector<1x8x128xf32>
    %100 = vector.shape_cast %99 : vector<1x8x128xf32> to vector<8x128xf32>
    %101 = vector.shape_cast %98 : vector<8x128xf32> to vector<1x8x128xf32>
    tpu.vector_store %arg10[%c7_72, %c0_73, %c0_74], %101 {strides = array<i32>} : memref<8x8x128xf32, #tpu.memory_space<vmem>>, vector<1x8x128xf32>,
    %c0_75 = arith.constant 0 : index
    %c0_76 = arith.constant 0 : index
    %c0_77 = arith.constant 0 : index
    %102 = vector.load %arg10[%c0_75, %c0_76, %c0_77] : memref<8x8x128xf32, #tpu.memory_space<vmem>>, vector<1x8x128xf32>
    %103 = vector.shape_cast %102 : vector<1x8x128xf32> to vector<8x128xf32>
    %cst_78 = arith.constant dense<0.000000e+00> : vector<8x128xf32>
    %104 = tpu.matmul %95, %12, %cst_78 {dimension_numbers = #tpu.dot_dimension_numbers<[1], [0], [0], [1], [0, 0, 1, 1], [], []>} : vector<8x128xf32>, vector<128x128xf32>, vector<8x128xf32> -> vector<8x128xf32>
    %105 = arith.addf %103, %104 : vector<8x128xf32>
    %106 = math.tanh %105 : vector<8x128xf32>
    %c0_79 = arith.constant 0 : index
    %c0_80 = arith.constant 0 : index
    %c0_81 = arith.constant 0 : index
    %107 = vector.load %arg8[%c0_79, %c0_80, %c0_81] : memref<8x8x128xf32, #tpu.memory_space<vmem>>, vector<1x8x128xf32>
    %108 = vector.shape_cast %107 : vector<1x8x128xf32> to vector<8x128xf32>
    %109 = vector.shape_cast %106 : vector<8x128xf32> to vector<1x8x128xf32>
    tpu.vector_store %arg8[%c0_79, %c0_80, %c0_81], %109 {strides = array<i32>} : memref<8x8x128xf32, #tpu.memory_space<vmem>>, vector<1x8x128xf32>,
    %c1_82 = arith.constant 1 : index
    %c0_83 = arith.constant 0 : index
    %c0_84 = arith.constant 0 : index
    %110 = vector.load %arg10[%c1_82, %c0_83, %c0_84] : memref<8x8x128xf32, #tpu.memory_space<vmem>>, vector<1x8x128xf32>
    %111 = vector.shape_cast %110 : vector<1x8x128xf32> to vector<8x128xf32>
    %cst_85 = arith.constant dense<0.000000e+00> : vector<8x128xf32>
    %112 = tpu.matmul %106, %12, %cst_85 {dimension_numbers = #tpu.dot_dimension_numbers<[1], [0], [0], [1], [0, 0, 1, 1], [], []>} : vector<8x128xf32>, vector<128x128xf32>, vector<8x128xf32> -> vector<8x128xf32>
    %113 = arith.addf %111, %112 : vector<8x128xf32>
    %114 = math.tanh %113 : vector<8x128xf32>
    %c1_86 = arith.constant 1 : index
    %c0_87 = arith.constant 0 : index
    %c0_88 = arith.constant 0 : index
    %115 = vector.load %arg8[%c1_86, %c0_87, %c0_88] : memref<8x8x128xf32, #tpu.memory_space<vmem>>, vector<1x8x128xf32>
    %116 = vector.shape_cast %115 : vector<1x8x128xf32> to vector<8x128xf32>
    %117 = vector.shape_cast %114 : vector<8x128xf32> to vector<1x8x128xf32>
    tpu.vector_store %arg8[%c1_86, %c0_87, %c0_88], %117 {strides = array<i32>} : memref<8x8x128xf32, #tpu.memory_space<vmem>>, vector<1x8x128xf32>,
    %c2_89 = arith.constant 2 : index
    %c0_90 = arith.constant 0 : index
    %c0_91 = arith.constant 0 : index
    %118 = vector.load %arg10[%c2_89, %c0_90, %c0_91] : memref<8x8x128xf32, #tpu.memory_space<vmem>>, vector<1x8x128xf32>
    %119 = vector.shape_cast %118 : vector<1x8x128xf32> to vector<8x128xf32>
    %cst_92 = arith.constant dense<0.000000e+00> : vector<8x128xf32>
    %120 = tpu.matmul %114, %12, %cst_92 {dimension_numbers = #tpu.dot_dimension_numbers<[1], [0], [0], [1], [0, 0, 1, 1], [], []>} : vector<8x128xf32>, vector<128x128xf32>, vector<8x128xf32> -> vector<8x128xf32>
    %121 = arith.addf %119, %120 : vector<8x128xf32>
    %122 = math.tanh %121 : vector<8x128xf32>
    %c2_93 = arith.constant 2 : index
    %c0_94 = arith.constant 0 : index
    %c0_95 = arith.constant 0 : index
    %123 = vector.load %arg8[%c2_93, %c0_94, %c0_95] : memref<8x8x128xf32, #tpu.memory_space<vmem>>, vector<1x8x128xf32>
    %124 = vector.shape_cast %123 : vector<1x8x128xf32> to vector<8x128xf32>
    %125 = vector.shape_cast %122 : vector<8x128xf32> to vector<1x8x128xf32>
    tpu.vector_store %arg8[%c2_93, %c0_94, %c0_95], %125 {strides = array<i32>} : memref<8x8x128xf32, #tpu.memory_space<vmem>>, vector<1x8x128xf32>,
    %c3_96 = arith.constant 3 : index
    %c0_97 = arith.constant 0 : index
    %c0_98 = arith.constant 0 : index
    %126 = vector.load %arg10[%c3_96, %c0_97, %c0_98] : memref<8x8x128xf32, #tpu.memory_space<vmem>>, vector<1x8x128xf32>
    %127 = vector.shape_cast %126 : vector<1x8x128xf32> to vector<8x128xf32>
    %cst_99 = arith.constant dense<0.000000e+00> : vector<8x128xf32>
    %128 = tpu.matmul %122, %12, %cst_99 {dimension_numbers = #tpu.dot_dimension_numbers<[1], [0], [0], [1], [0, 0, 1, 1], [], []>} : vector<8x128xf32>, vector<128x128xf32>, vector<8x128xf32> -> vector<8x128xf32>
    %129 = arith.addf %127, %128 : vector<8x128xf32>
    %130 = math.tanh %129 : vector<8x128xf32>
    %c3_100 = arith.constant 3 : index
    %c0_101 = arith.constant 0 : index
    %c0_102 = arith.constant 0 : index
    %131 = vector.load %arg8[%c3_100, %c0_101, %c0_102] : memref<8x8x128xf32, #tpu.memory_space<vmem>>, vector<1x8x128xf32>
    %132 = vector.shape_cast %131 : vector<1x8x128xf32> to vector<8x128xf32>
    %133 = vector.shape_cast %130 : vector<8x128xf32> to vector<1x8x128xf32>
    tpu.vector_store %arg8[%c3_100, %c0_101, %c0_102], %133 {strides = array<i32>} : memref<8x8x128xf32, #tpu.memory_space<vmem>>, vector<1x8x128xf32>,
    %c4_103 = arith.constant 4 : index
    %c0_104 = arith.constant 0 : index
    %c0_105 = arith.constant 0 : index
    %134 = vector.load %arg10[%c4_103, %c0_104, %c0_105] : memref<8x8x128xf32, #tpu.memory_space<vmem>>, vector<1x8x128xf32>
    %135 = vector.shape_cast %134 : vector<1x8x128xf32> to vector<8x128xf32>
    %cst_106 = arith.constant dense<0.000000e+00> : vector<8x128xf32>
    %136 = tpu.matmul %130, %12, %cst_106 {dimension_numbers = #tpu.dot_dimension_numbers<[1], [0], [0], [1], [0, 0, 1, 1], [], []>} : vector<8x128xf32>, vector<128x128xf32>, vector<8x128xf32> -> vector<8x128xf32>
    %137 = arith.addf %135, %136 : vector<8x128xf32>
    %138 = math.tanh %137 : vector<8x128xf32>
    %c4_107 = arith.constant 4 : index
    %c0_108 = arith.constant 0 : index
    %c0_109 = arith.constant 0 : index
    %139 = vector.load %arg8[%c4_107, %c0_108, %c0_109] : memref<8x8x128xf32, #tpu.memory_space<vmem>>, vector<1x8x128xf32>
    %140 = vector.shape_cast %139 : vector<1x8x128xf32> to vector<8x128xf32>
    %141 = vector.shape_cast %138 : vector<8x128xf32> to vector<1x8x128xf32>
    tpu.vector_store %arg8[%c4_107, %c0_108, %c0_109], %141 {strides = array<i32>} : memref<8x8x128xf32, #tpu.memory_space<vmem>>, vector<1x8x128xf32>,
    %c5_110 = arith.constant 5 : index
    %c0_111 = arith.constant 0 : index
    %c0_112 = arith.constant 0 : index
    %142 = vector.load %arg10[%c5_110, %c0_111, %c0_112] : memref<8x8x128xf32, #tpu.memory_space<vmem>>, vector<1x8x128xf32>
    %143 = vector.shape_cast %142 : vector<1x8x128xf32> to vector<8x128xf32>
    %cst_113 = arith.constant dense<0.000000e+00> : vector<8x128xf32>
    %144 = tpu.matmul %138, %12, %cst_113 {dimension_numbers = #tpu.dot_dimension_numbers<[1], [0], [0], [1], [0, 0, 1, 1], [], []>} : vector<8x128xf32>, vector<128x128xf32>, vector<8x128xf32> -> vector<8x128xf32>
    %145 = arith.addf %143, %144 : vector<8x128xf32>
    %146 = math.tanh %145 : vector<8x128xf32>
    %c5_114 = arith.constant 5 : index
    %c0_115 = arith.constant 0 : index
    %c0_116 = arith.constant 0 : index
    %147 = vector.load %arg8[%c5_114, %c0_115, %c0_116] : memref<8x8x128xf32, #tpu.memory_space<vmem>>, vector<1x8x128xf32>
    %148 = vector.shape_cast %147 : vector<1x8x128xf32> to vector<8x128xf32>
    %149 = vector.shape_cast %146 : vector<8x128xf32> to vector<1x8x128xf32>
    tpu.vector_store %arg8[%c5_114, %c0_115, %c0_116], %149 {strides = array<i32>} : memref<8x8x128xf32, #tpu.memory_space<vmem>>, vector<1x8x128xf32>,
    %c6_117 = arith.constant 6 : index
    %c0_118 = arith.constant 0 : index
    %c0_119 = arith.constant 0 : index
    %150 = vector.load %arg10[%c6_117, %c0_118, %c0_119] : memref<8x8x128xf32, #tpu.memory_space<vmem>>, vector<1x8x128xf32>
    %151 = vector.shape_cast %150 : vector<1x8x128xf32> to vector<8x128xf32>
    %cst_120 = arith.constant dense<0.000000e+00> : vector<8x128xf32>
    %152 = tpu.matmul %146, %12, %cst_120 {dimension_numbers = #tpu.dot_dimension_numbers<[1], [0], [0], [1], [0, 0, 1, 1], [], []>} : vector<8x128xf32>, vector<128x128xf32>, vector<8x128xf32> -> vector<8x128xf32>
    %153 = arith.addf %151, %152 : vector<8x128xf32>
    %154 = math.tanh %153 : vector<8x128xf32>
    %c6_121 = arith.constant 6 : index
    %c0_122 = arith.constant 0 : index
    %c0_123 = arith.constant 0 : index
    %155 = vector.load %arg8[%c6_121, %c0_122, %c0_123] : memref<8x8x128xf32, #tpu.memory_space<vmem>>, vector<1x8x128xf32>
    %156 = vector.shape_cast %155 : vector<1x8x128xf32> to vector<8x128xf32>
    %157 = vector.shape_cast %154 : vector<8x128xf32> to vector<1x8x128xf32>
    tpu.vector_store %arg8[%c6_121, %c0_122, %c0_123], %157 {strides = array<i32>} : memref<8x8x128xf32, #tpu.memory_space<vmem>>, vector<1x8x128xf32>,
    %c7_124 = arith.constant 7 : index
    %c0_125 = arith.constant 0 : index
    %c0_126 = arith.constant 0 : index
    %158 = vector.load %arg10[%c7_124, %c0_125, %c0_126] : memref<8x8x128xf32, #tpu.memory_space<vmem>>, vector<1x8x128xf32>
    %159 = vector.shape_cast %158 : vector<1x8x128xf32> to vector<8x128xf32>
    %cst_127 = arith.constant dense<0.000000e+00> : vector<8x128xf32>
    %160 = tpu.matmul %154, %12, %cst_127 {dimension_numbers = #tpu.dot_dimension_numbers<[1], [0], [0], [1], [0, 0, 1, 1], [], []>} : vector<8x128xf32>, vector<128x128xf32>, vector<8x128xf32> -> vector<8x128xf32>
    %161 = arith.addf %159, %160 : vector<8x128xf32>
    %162 = math.tanh %161 : vector<8x128xf32>
    %c7_128 = arith.constant 7 : index
    %c0_129 = arith.constant 0 : index
    %c0_130 = arith.constant 0 : index
    %163 = vector.load %arg8[%c7_128, %c0_129, %c0_130] : memref<8x8x128xf32, #tpu.memory_space<vmem>>, vector<1x8x128xf32>
    %164 = vector.shape_cast %163 : vector<1x8x128xf32> to vector<8x128xf32>
    %165 = vector.shape_cast %162 : vector<8x128xf32> to vector<1x8x128xf32>
    tpu.vector_store %arg8[%c7_128, %c0_129, %c0_130], %165 {strides = array<i32>} : memref<8x8x128xf32, #tpu.memory_space<vmem>>, vector<1x8x128xf32>,
    return
  }
  func.func @transform_0(%arg0: i32) -> (i32, i32, i32) {
    %c0_i32 = arith.constant 0 : i32
    %c0_i32_0 = arith.constant 0 : i32
    %c0_i32_1 = arith.constant 0 : i32
    return %c0_i32, %arg0, %c0_i32_0 : i32, i32, i32
  }
  func.func @transform_1(%arg0: i32) -> (i32, i32) {
    %c0_i32 = arith.constant 0 : i32
    %c0_i32_0 = arith.constant 0 : i32
    %c0_i32_1 = arith.constant 0 : i32
    return %c0_i32, %c0_i32_0 : i32, i32
  }
  func.func @transform_2(%arg0: i32) -> (i32, i32) {
    %c0_i32 = arith.constant 0 : i32
    %c0_i32_0 = arith.constant 0 : i32
    %c0_i32_1 = arith.constant 0 : i32
    return %c0_i32, %c0_i32_0 : i32, i32
  }
  func.func @transform_3(%arg0: i32) -> (i32, i32) {
    %c0_i32 = arith.constant 0 : i32
    %c0_i32_0 = arith.constant 0 : i32
    %c0_i32_1 = arith.constant 0 : i32
    return %c0_i32, %c0_i32_0 : i32, i32
  }
  func.func @transform_4(%arg0: i32) -> (i32, i32) {
    %c0_i32 = arith.constant 0 : i32
    %c0_i32_0 = arith.constant 0 : i32
    %c0_i32_1 = arith.constant 0 : i32
    return %c0_i32, %c0_i32_0 : i32, i32
  }
  func.func @transform_5(%arg0: i32) -> (i32, i32) {
    %c0_i32 = arith.constant 0 : i32
    %c0_i32_0 = arith.constant 0 : i32
    %c0_i32_1 = arith.constant 0 : i32
    return %c0_i32, %c0_i32_0 : i32, i32
  }
  func.func @transform_6(%arg0: i32) -> (i32, i32) {
    %c0_i32 = arith.constant 0 : i32
    %c0_i32_0 = arith.constant 0 : i32
    %c0_i32_1 = arith.constant 0 : i32
    return %c0_i32, %c0_i32_0 : i32, i32
  }
  func.func @transform_7(%arg0: i32) -> (i32, i32, i32) {
    %c0_i32 = arith.constant 0 : i32
    %c0_i32_0 = arith.constant 0 : i32
    %c0_i32_1 = arith.constant 0 : i32
    return %c0_i32, %arg0, %c0_i32_0 : i32, i32, i32
  }
}

</mosaic_0001>

<bundles_post_ra>
// kernel: rnn_block_pallas.1
= control target key start
LH: loop header
LB: loop body
LE: loop exit
PB: predicated region body
PF: predicated region fallthrough
CT: control target
= control target key end

     0   :  { %v766_v43 = vmov 0.0   ;;  %s1552_s1 = inlined_call_operand.vmem [shape: f32[128,128], index: 1, kind: input, shape index: {}]   ;;  %s1553_s2 = inlined_call_operand.vmem [shape: f32[128,128], index: 2, kind: input, shape index: {}]   ;;  %s1554_s4 = inlined_call_operand.vmem [shape: f32[128,128], index: 4, kind: input, shape index: {}]   ;;  %s1555_s3 = inlined_call_operand.vmem [shape: f32[1,128], index: 3, kind: input, shape index: {}]   ;;  %s1556_s0 = inlined_call_operand.vmem [shape: f32[8,8,128], index: 0, kind: input, shape index: {}]   ;;  %s1557_s6 = inlined_call_operand.vmem [shape: f32[1,128], index: 6, kind: input, shape index: {}]   ;;  %s1558_s5 = inlined_call_operand.vmem [shape: f32[128,128], index: 5, kind: input, shape index: {}]   ;;  %s1559_s7 = inlined_call_operand.vmem [shape: f32[8,8,128], index: 7, kind: output, shape index: {}]  }
   0x1   :  { %v49_v0 = vld [vmem:[%s1552_s1 + $0x78] sm:$0xff]  ;;  %v48_v1 = vld [vmem:[%s1552_s1 + $0x70] sm:$0xff]  ;;  %v47_v4 = vld [vmem:[%s1552_s1 + $0x68] sm:$0xff] }
   0x2   :  { %v816_v2 = vld [vmem:[%s1553_s2 + $0x78] sm:$0xff]  ;;  %54 = vmatpush.msra.mxu0 %v49_v0  ;;  %v822_v3 = vld [vmem:[%s1553_s2 + $0x70] sm:$0xff]  ;;  %v830_v5 = vld [vmem:[%s1553_s2 + $0x68] sm:$0xff] }
   0x3   :  { %153 = vmatpush.msra.mxu1 %v816_v2  ;;  %201 = vmatpush.msra.mxu3 %v816_v2  ;;  %v46_v6 = vld [vmem:[%s1552_s1 + $0x60] sm:$0xff]  ;;  %v45_v8 = vld [vmem:[%s1552_s1 + $0x58] sm:$0xff]  ;;  %v44_v10 = vld [vmem:[%s1552_s1 + $0x50] sm:$0xff] }
   0x4   :  { %55 = vmatpush.msra.mxu0 %v48_v1  ;;  %v840_v7 = vld [vmem:[%s1553_s2 + $0x60] sm:$0xff]  ;;  %v850_v9 = vld [vmem:[%s1553_s2 + $0x58] sm:$0xff]  ;;  %v860_v11 = vld [vmem:[%s1553_s2 + $0x50] sm:$0xff] }
   0x5   :  { %154 = vmatpush.msra.mxu1 %v822_v3  ;;  %202 = vmatpush.msra.mxu3 %v822_v3  ;;  %v43_v12 = vld [vmem:[%s1552_s1 + $0x48] sm:$0xff]  ;;  %v877_v14 = vld [vmem:[%s1554_s4 + $0x78] sm:$0xff]  ;;  %v882_v15 = vld [vmem:[%s1554_s4 + $0x70] sm:$0xff] }
   0x6   :  { %56 = vmatpush.msra.mxu0 %v47_v4  ;;  %v870_v13 = vld [vmem:[%s1553_s2 + $0x48] sm:$0xff]  ;;  %v42_v16 = vld [vmem:[%s1552_s1 + $0x40] sm:$0xff]  ;;  %178 = vmatpush.msra.mxu2 %v877_v14  ;;  %v41_v19 = vld [vmem:[%s1552_s1 + $0x38] sm:$0xff] }
   0x7   :  { %155 = vmatpush.msra.mxu1 %v830_v5  ;;  %203 = vmatpush.msra.mxu3 %v830_v5  ;;  %v890_v17 = vld [vmem:[%s1553_s2 + $0x40] sm:$0xff]  ;;  %v898_v18 = vld [vmem:[%s1554_s4 + $0x68] sm:$0xff]  ;;  %v906_v20 = vld [vmem:[%s1553_s2 + $0x38] sm:$0xff] }
   0x8   :  { %57 = vmatpush.msra.mxu0 %v46_v6  ;;  %179 = vmatpush.msra.mxu2 %v882_v15  ;;  %v914_v21 = vld [vmem:[%s1554_s4 + $0x60] sm:$0xff]  ;;  %v40_v22 = vld [vmem:[%s1552_s1 + $0x30] sm:$0xff]  ;;  %v930_v24 = vld [vmem:[%s1554_s4 + $0x58] sm:$0xff] }
   0x9   :  { %156 = vmatpush.msra.mxu1 %v840_v7  ;;  %204 = vmatpush.msra.mxu3 %v840_v7  ;;  %v922_v23 = vld [vmem:[%s1553_s2 + $0x30] sm:$0xff]  ;;  %v39_v25 = vld [vmem:[%s1552_s1 + $0x28] sm:$0xff]  ;;  %v38_v28 = vld [vmem:[%s1552_s1 + $0x20] sm:$0xff] }
   0xa   :  { %58 = vmatpush.msra.mxu0 %v45_v8  ;;  %180 = vmatpush.msra.mxu2 %v898_v18  ;;  %v938_v26 = vld [vmem:[%s1553_s2 + $0x28] sm:$0xff]  ;;  %v946_v27 = vld [vmem:[%s1554_s4 + $0x50] sm:$0xff]  ;;  %v954_v29 = vld [vmem:[%s1553_s2 + $0x20] sm:$0xff] }
   0xb   :  { %157 = vmatpush.msra.mxu1 %v850_v9  ;;  %205 = vmatpush.msra.mxu3 %v850_v9  ;;  %v962_v30 = vld [vmem:[%s1554_s4 + $0x48] sm:$0xff]  ;;  %v37_v31 = vld [vmem:[%s1552_s1 + $0x18] sm:$0xff]  ;;  %v978_v33 = vld [vmem:[%s1554_s4 + $0x40] sm:$0xff] }
   0xc   :  { %59 = vmatpush.msra.mxu0 %v44_v10  ;;  %181 = vmatpush.msra.mxu2 %v914_v21  ;;  %v970_v32 = vld [vmem:[%s1553_s2 + $0x18] sm:$0xff]  ;;  %v36_v34 = vld [vmem:[%s1552_s1 + $0x10] sm:$0xff]  ;;  %v35_v37 = vld [vmem:[%s1552_s1 + $0x8] sm:$0xff] }
   0xd   :  { %158 = vmatpush.msra.mxu1 %v860_v11  ;;  %206 = vmatpush.msra.mxu3 %v860_v11  ;;  %v986_v35 = vld [vmem:[%s1553_s2 + $0x10] sm:$0xff]  ;;  %v994_v36 = vld [vmem:[%s1554_s4 + $0x38] sm:$0xff]  ;;  %v1002_v38 = vld [vmem:[%s1553_s2 + $0x8] sm:$0xff] }
   0xe   :  { %60 = vmatpush.msra.mxu0 %v43_v12  ;;  %182 = vmatpush.msra.mxu2 %v930_v24  ;;  %v1010_v39 = vld [vmem:[%s1554_s4 + $0x30] sm:$0xff]  ;;  %v34_v40 = vld [vmem:[%s1552_s1] sm:$0xff]  ;;  %v1085_v44 = vld [vmem:[%s1554_s4 + $0x28] sm:$0xff] }
   0xf   :  { %159 = vmatpush.msra.mxu1 %v870_v13  ;;  %207 = vmatpush.msra.mxu3 %v870_v13  ;;  %v1018_v41 = vld [vmem:[%s1553_s2] sm:$0xff]  ;;  %v1100_v46 = vld [vmem:[%s1554_s4 + $0x18] sm:$0xff]  ;;  %v1107_v47 = vld [vmem:[%s1554_s4 + $0x10] sm:$0xff] }
  0x10   :  { %61 = vmatpush.msra.mxu0 %v42_v16  ;;  %183 = vmatpush.msra.mxu2 %v946_v27  ;;  %v26_v42 = vld [vmem:[%s1556_s0] sm:$0xff]  ;;  %v1113_v48 = vld [vmem:[%s1554_s4 + $0x8] sm:$0xff]  ;;  %v28_v57 = vld [vmem:[%s1556_s0 + $0x10] sm:$0xff] }
  0x11   :  { %160 = vmatpush.msra.mxu1 %v890_v17  ;;  %208 = vmatpush.msra.mxu3 %v890_v17  ;;  %v1092_v45 = vld [vmem:[%s1554_s4 + $0x20] sm:$0xff]  ;;  %v27_v50 = vld [vmem:[%s1556_s0 + $0x8] sm:$0xff]  ;;  %v29_v58 = vld [vmem:[%s1556_s0 + $0x18] sm:$0xff] }
  0x12   :  { %62 = vmatpush.msra.mxu0 %v41_v19  ;;  %184 = vmatpush.msra.mxu2 %v962_v30  ;;  %v1121_v49 = vld [vmem:[%s1554_s4] sm:$0xff]  ;;  %v31_v63 = vld [vmem:[%s1556_s0 + $0x28] sm:$0xff]  ;;  %v32_v1 = vld [vmem:[%s1556_s0 + $0x30] sm:$0xff] }
  0x13   :  { %161 = vmatpush.msra.mxu1 %v906_v20  ;;  %209 = vmatpush.msra.mxu3 %v906_v20  ;;  %v1153_v51 = vld [vmem:[%s1555_s3] ss:$0 sm:$0xff]  ;;  %v33_v6 = vld [vmem:[%s1556_s0 + $0x38] sm:$0xff] }
  0x14   :  { %63 = vmatpush.msra.mxu0 %v40_v22  ;;  %185 = vmatpush.msra.mxu2 %v978_v33  ;;  %v30_v59 = vld [vmem:[%s1556_s0 + $0x20] sm:$0xff] }
  0x15   :  { %162 = vmatpush.msra.mxu1 %v922_v23  ;;  %210 = vmatpush.msra.mxu3 %v922_v23 }
  0x16   :  { %64 = vmatpush.msra.mxu0 %v39_v25  ;;  %186 = vmatpush.msra.mxu2 %v994_v36 }
  0x17   :  { %163 = vmatpush.msra.mxu1 %v938_v26  ;;  %211 = vmatpush.msra.mxu3 %v938_v26 }
  0x18   :  { %65 = vmatpush.msra.mxu0 %v38_v28  ;;  %187 = vmatpush.msra.mxu2 %v1010_v39  ;;  %v1320_v28 = vld [vmem:[%s1558_s5 + $0x70] sm:$0xff] }
  0x19   :  { %164 = vmatpush.msra.mxu1 %v954_v29  ;;  %212 = vmatpush.msra.mxu3 %v954_v29 }
  0x1a   :  { %66 = vmatpush.msra.mxu0 %v37_v31  ;;  %188 = vmatpush.msra.mxu2 %v1085_v44  ;;  %v1345_v31 = vld [vmem:[%s1558_s5 + $0x58] sm:$0xff] }
  0x1b   :  { %165 = vmatpush.msra.mxu1 %v970_v32  ;;  %213 = vmatpush.msra.mxu3 %v970_v32 }
  0x1c   :  { %67 = vmatpush.msra.mxu0 %v36_v34  ;;  %189 = vmatpush.msra.mxu2 %v1092_v45  ;;  %v1372_v34 = vld [vmem:[%s1558_s5 + $0x40] sm:$0xff] }
  0x1d   :  { %166 = vmatpush.msra.mxu1 %v986_v35  ;;  %214 = vmatpush.msra.mxu3 %v986_v35 }
  0x1e   :  { %68 = vmatpush.msra.mxu0 %v35_v37  ;;  %190 = vmatpush.msra.mxu2 %v1100_v46  ;;  %v1399_v37 = vld [vmem:[%s1558_s5 + $0x28] sm:$0xff] }
  0x1f   :  { %167 = vmatpush.msra.mxu1 %v1002_v38  ;;  %215 = vmatpush.msra.mxu3 %v1002_v38 }
  0x20   :  { %69 = vmatpush.msra.mxu0 %v34_v40  ;;  %191 = vmatpush.msra.mxu2 %v1107_v47 }
  0x21   :  { %168 = vmatpush.msra.mxu1 %v1018_v41  ;;  %70 = vmatmul.f32.vlgmr.msra.gmra.mxu0 %v26_v42  ;;  %v1416_v42 = vld [vmem:[%s1558_s5 + $0x20] sm:$0xff] }
  0x22   :  { %169 = vmatmul.f32.vlgmr.msra.gmra.mxu1 %v766_v43  ;;  %216 = vmatpush.msra.mxu3 %v1018_v41  ;;  %v1423_v43 = vld [vmem:[%s1558_s5 + $0x18] sm:$0xff] }
  0x23   :  { %223 = vmatpush.msrb.mxu1 %v877_v14  ;;  %293 = vmatpush.msrb.mxu0 %v816_v2 }
  0x24   :  { %269 = vmatpush.msrb.mxu3 %v877_v14  ;;  %192 = vmatpush.msra.mxu2 %v1113_v48 }
  0x25   :  { %224 = vmatpush.msrb.mxu1 %v882_v15  ;;  %294 = vmatpush.msrb.mxu0 %v822_v3 }
  0x26   :  { %270 = vmatpush.msrb.mxu3 %v882_v15  ;;  %193 = vmatpush.msra.mxu2 %v1121_v49 }
  0x27   :  { %225 = vmatpush.msrb.mxu1 %v898_v18  ;;  %295 = vmatpush.msrb.mxu0 %v830_v5 }
  0x28   :  { %271 = vmatpush.msrb.mxu3 %v898_v18  ;;  %247 = vmatpush.msrb.mxu2 %v816_v2 }
  0x29   :  { %226 = vmatpush.msrb.mxu1 %v914_v21  ;;  %296 = vmatpush.msrb.mxu0 %v840_v7 }
  0x2a   :  { %272 = vmatpush.msrb.mxu3 %v914_v21  ;;  %73 = vmatmul.f32.gmra.mxu0 %v27_v50 }
  0x2b   :  { %227 = vmatpush.msrb.mxu1 %v930_v24  ;;  %297 = vmatpush.msrb.mxu0 %v850_v9 }
  0x2c   :  { %273 = vmatpush.msrb.mxu3 %v930_v24  ;;  %248 = vmatpush.msrb.mxu2 %v822_v3 }
  0x2d   :  { %228 = vmatpush.msrb.mxu1 %v946_v27  ;;  %298 = vmatpush.msrb.mxu0 %v860_v11 }
  0x2e   :  { %274 = vmatpush.msrb.mxu3 %v946_v27  ;;  %249 = vmatpush.msrb.mxu2 %v830_v5 }
  0x2f   :  { %229 = vmatpush.msrb.mxu1 %v962_v30  ;;  %299 = vmatpush.msrb.mxu0 %v870_v13 }
  0x30   :  { %275 = vmatpush.msrb.mxu3 %v962_v30  ;;  %250 = vmatpush.msrb.mxu2 %v840_v7 }
  0x31   :  { %230 = vmatpush.msrb.mxu1 %v978_v33  ;;  %300 = vmatpush.msrb.mxu0 %v890_v17 }
  0x32   :  { %276 = vmatpush.msrb.mxu3 %v978_v33  ;;  %251 = vmatpush.msrb.mxu2 %v850_v9 }
  0x33   :  { %231 = vmatpush.msrb.mxu1 %v994_v36  ;;  %301 = vmatpush.msrb.mxu0 %v906_v20 }
  0x34   :  { %277 = vmatpush.msrb.mxu3 %v994_v36  ;;  %252 = vmatpush.msrb.mxu2 %v860_v11 }
  0x35   :  { %232 = vmatpush.msrb.mxu1 %v1010_v39  ;;  %302 = vmatpush.msrb.mxu0 %v922_v23 }
  0x36   :  { %278 = vmatpush.msrb.mxu3 %v1010_v39  ;;  %253 = vmatpush.msrb.mxu2 %v870_v13 }
  0x37   :  { %303 = vmatpush.msrb.mxu0 %v938_v26  ;;  %233 = vmatpush.msrb.mxu1 %v1085_v44 }
  0x38   :  { %279 = vmatpush.msrb.mxu3 %v1085_v44  ;;  %254 = vmatpush.msrb.mxu2 %v890_v17 }
  0x39   :  { %304 = vmatpush.msrb.mxu0 %v954_v29  ;;  %234 = vmatpush.msrb.mxu1 %v1092_v45 }
  0x3a   :  { %280 = vmatpush.msrb.mxu3 %v1092_v45  ;;  %255 = vmatpush.msrb.mxu2 %v906_v20 }
  0x3b   :  { %305 = vmatpush.msrb.mxu0 %v970_v32  ;;  %235 = vmatpush.msrb.mxu1 %v1100_v46 }
  0x3c   :  { %281 = vmatpush.msrb.mxu3 %v1100_v46  ;;  %256 = vmatpush.msrb.mxu2 %v922_v23 }
  0x3d   :  { %306 = vmatpush.msrb.mxu0 %v986_v35  ;;  %236 = vmatpush.msrb.mxu1 %v1107_v47 }
  0x3e   :  { %282 = vmatpush.msrb.mxu3 %v1107_v47  ;;  %257 = vmatpush.msrb.mxu2 %v938_v26 }
  0x3f   :  { %307 = vmatpush.msrb.mxu0 %v1002_v38  ;;  %237 = vmatpush.msrb.mxu1 %v1113_v48 }
  0x40   :  { %283 = vmatpush.msrb.mxu3 %v1113_v48  ;;  %258 = vmatpush.msrb.mxu2 %v954_v29 }
  0x41   :  { %308 = vmatpush.msrb.mxu0 %v1018_v41  ;;  %238 = vmatpush.msrb.mxu1 %v1121_v49 }
  0x42   :  { %284 = vmatpush.msrb.mxu3 %v1121_v49  ;;  %259 = vmatpush.msrb.mxu2 %v970_v32 }
  0x43   :  { %385 = vmatpush.msra.mxu0 %v816_v2  ;;  %315 = vmatpush.msra.mxu1 %v877_v14 }
  0x44   :  { %260 = vmatpush.msrb.mxu2 %v986_v35  ;;  %76 = vmatmul.f32.gmra.mxu0 %v28_v57 }
  0x45   :  { %386 = vmatpush.msra.mxu0 %v822_v3  ;;  %316 = vmatpush.msra.mxu1 %v882_v15 }
  0x46   :  { %261 = vmatpush.msrb.mxu2 %v1002_v38 }
  0x47   :  { %387 = vmatpush.msra.mxu0 %v830_v5  ;;  %317 = vmatpush.msra.mxu1 %v898_v18 }
  0x48   :  { %262 = vmatpush.msrb.mxu2 %v1018_v41 }
  0x49   :  { %388 = vmatpush.msra.mxu0 %v840_v7  ;;  %318 = vmatpush.msra.mxu1 %v914_v21 }
  0x4b   :  { %389 = vmatpush.msra.mxu0 %v850_v9  ;;  %319 = vmatpush.msra.mxu1 %v930_v24 }
  0x4c   :  { %79 = vmatmul.f32.gmra.mxu0 %v29_v58 }
  0x4d   :  { %390 = vmatpush.msra.mxu0 %v860_v11  ;;  %320 = vmatpush.msra.mxu1 %v946_v27 }
  0x4f   :  { %391 = vmatpush.msra.mxu0 %v870_v13  ;;  %321 = vmatpush.msra.mxu1 %v962_v30 }
  0x51   :  { %392 = vmatpush.msra.mxu0 %v890_v17  ;;  %322 = vmatpush.msra.mxu1 %v978_v33 }
  0x53   :  { %393 = vmatpush.msra.mxu0 %v906_v20  ;;  %323 = vmatpush.msra.mxu1 %v994_v36 }
  0x54   :  { %82 = vmatmul.f32.gmra.mxu0 %v30_v59 }
  0x55   :  { %394 = vmatpush.msra.mxu0 %v922_v23  ;;  %324 = vmatpush.msra.mxu1 %v1010_v39 }
  0x57   :  { %395 = vmatpush.msra.mxu0 %v938_v26  ;;  %325 = vmatpush.msra.mxu1 %v1085_v44 }
  0x59   :  { %396 = vmatpush.msra.mxu0 %v954_v29  ;;  %326 = vmatpush.msra.mxu1 %v1092_v45 }
  0x5b   :  { %397 = vmatpush.msra.mxu0 %v970_v32  ;;  %327 = vmatpush.msra.mxu1 %v1100_v46 }
  0x5c   :  { %85 = vmatmul.f32.gmra.mxu0 %v31_v63 }
  0x5d   :  { %398 = vmatpush.msra.mxu0 %v986_v35  ;;  %328 = vmatpush.msra.mxu1 %v1107_v47 }
  0x5f   :  { %399 = vmatpush.msra.mxu0 %v1002_v38  ;;  %329 = vmatpush.msra.mxu1 %v1113_v48 }
  0x61   :  { %400 = vmatpush.msra.mxu0 %v1018_v41  ;;  %330 = vmatpush.msra.mxu1 %v1121_v49 }
  0x64   :  { %88 = vmatmul.f32.gmra.mxu0 %v32_v1 }
  0x6c   :  { %91 = vmatmul.f32.gmra.mxu0 %v33_v6 }
  0x9e   :  { %v71_v52 = vpop.f32.mrf.mxu0 }
  0x9f   :  { %v170_v53 = vpop.f32.mrf.mxu1  ;;  %v72_v54 = vadd.f32 %v1153_v51, %v71_v52 }
  0xa1   :  { %v173_v55 = vadd.f32 %v170_v53, %v72_v54 }
  0xa3   :  { %734 = vtanh.f32 %v173_v55 }
  0xa7   :  { %v74_v60 = vpop.f32.mrf.mxu0 }
  0xa8   :  { %v75_v61 = vadd.f32 %v1153_v51, %v74_v60 }
  0xa9   :  { %v735_v56 = vpop.eup %734 }
  0xaa   :  { %194 = vmatmul.f32.vlgmr.msra.gmra.mxu2 %v735_v56  ;;  %217 = vmatmul.f32.vlgmr.msra.gmra.mxu3 %v735_v56 }
  0xab   :  { %339 = vmatpush.msra.mxu2 %v816_v2  ;;  %361 = vmatpush.msra.mxu3 %v877_v14 }
  0xad   :  { %340 = vmatpush.msra.mxu2 %v822_v3  ;;  %362 = vmatpush.msra.mxu3 %v882_v15 }
  0xaf   :  { %341 = vmatpush.msra.mxu2 %v830_v5  ;;  %363 = vmatpush.msra.mxu3 %v898_v18 }
  0xb1   :  { %342 = vmatpush.msra.mxu2 %v840_v7  ;;  %364 = vmatpush.msra.mxu3 %v914_v21 }
  0xb3   :  { %343 = vmatpush.msra.mxu2 %v850_v9  ;;  %365 = vmatpush.msra.mxu3 %v930_v24 }
  0xb5   :  { %344 = vmatpush.msra.mxu2 %v860_v11  ;;  %366 = vmatpush.msra.mxu3 %v946_v27 }
  0xb7   :  { %345 = vmatpush.msra.mxu2 %v870_v13  ;;  %367 = vmatpush.msra.mxu3 %v962_v30 }
  0xb9   :  { %346 = vmatpush.msra.mxu2 %v890_v17  ;;  %368 = vmatpush.msra.mxu3 %v978_v33 }
  0xbb   :  { %347 = vmatpush.msra.mxu2 %v906_v20  ;;  %369 = vmatpush.msra.mxu3 %v994_v36 }
  0xbd   :  { %348 = vmatpush.msra.mxu2 %v922_v23  ;;  %370 = vmatpush.msra.mxu3 %v1010_v39 }
  0xbf   :  { %349 = vmatpush.msra.mxu2 %v938_v26  ;;  %371 = vmatpush.msra.mxu3 %v1085_v44 }
  0xc1   :  { %350 = vmatpush.msra.mxu2 %v954_v29  ;;  %372 = vmatpush.msra.mxu3 %v1092_v45  ;;  %v77_v10 = vpop.f32.mrf.mxu0 }
  0xc2   :  { %v78_v12 = vadd.f32 %v1153_v51, %v77_v10 }
  0xc3   :  { %351 = vmatpush.msra.mxu2 %v970_v32  ;;  %373 = vmatpush.msra.mxu3 %v1100_v46 }
  0xc5   :  { %352 = vmatpush.msra.mxu2 %v986_v35  ;;  %374 = vmatpush.msra.mxu3 %v1107_v47 }
  0xc7   :  { %353 = vmatpush.msra.mxu2 %v1002_v38  ;;  %375 = vmatpush.msra.mxu3 %v1113_v48 }
  0xc9   :  { %354 = vmatpush.msra.mxu2 %v1018_v41  ;;  %376 = vmatpush.msra.mxu3 %v1121_v49 }
 0x12d   :  { %v218_v62 = vpop.f32.mrf.mxu3  ;;  %v1254_v8 = vpop.f32.mrf.mxu2 }
 0x12e   :  { %v221_v0 = vadd.f32 %v218_v62, %v75_v61 }
 0x130   :  { %736 = vtanh.f32 %v221_v0 }
 0x136   :  { %v737_v4 = vpop.eup %736 }
 0x137   :  { %239 = vmatmul.f32.vlgmr.msrb.gmra.mxu1 %v737_v4  ;;  %263 = vmatmul.f32.vlgmr.msrb.gmra.mxu2 %v737_v4 }
 0x138   :  { %407 = vmatpush.msrb.mxu1 %v877_v14  ;;  %431 = vmatpush.msrb.mxu2 %v816_v2 }
 0x13a   :  { %408 = vmatpush.msrb.mxu1 %v882_v15  ;;  %432 = vmatpush.msrb.mxu2 %v822_v3 }
 0x13c   :  { %409 = vmatpush.msrb.mxu1 %v898_v18  ;;  %433 = vmatpush.msrb.mxu2 %v830_v5 }
 0x13e   :  { %410 = vmatpush.msrb.mxu1 %v914_v21  ;;  %434 = vmatpush.msrb.mxu2 %v840_v7 }
 0x140   :  { %411 = vmatpush.msrb.mxu1 %v930_v24  ;;  %435 = vmatpush.msrb.mxu2 %v850_v9 }
 0x142   :  { %412 = vmatpush.msrb.mxu1 %v946_v27  ;;  %436 = vmatpush.msrb.mxu2 %v860_v11 }
 0x144   :  { %413 = vmatpush.msrb.mxu1 %v962_v30  ;;  %437 = vmatpush.msrb.mxu2 %v870_v13 }
 0x146   :  { %414 = vmatpush.msrb.mxu1 %v978_v33  ;;  %438 = vmatpush.msrb.mxu2 %v890_v17 }
 0x148   :  { %415 = vmatpush.msrb.mxu1 %v994_v36  ;;  %439 = vmatpush.msrb.mxu2 %v906_v20 }
 0x14a   :  { %416 = vmatpush.msrb.mxu1 %v1010_v39  ;;  %440 = vmatpush.msrb.mxu2 %v922_v23 }
 0x14c   :  { %417 = vmatpush.msrb.mxu1 %v1085_v44  ;;  %441 = vmatpush.msrb.mxu2 %v938_v26 }
 0x14e   :  { %418 = vmatpush.msrb.mxu1 %v1092_v45  ;;  %442 = vmatpush.msrb.mxu2 %v954_v29 }
 0x150   :  { %419 = vmatpush.msrb.mxu1 %v1100_v46  ;;  %443 = vmatpush.msrb.mxu2 %v970_v32 }
 0x152   :  { %420 = vmatpush.msrb.mxu1 %v1107_v47  ;;  %444 = vmatpush.msrb.mxu2 %v986_v35 }
 0x154   :  { %421 = vmatpush.msrb.mxu1 %v1113_v48  ;;  %445 = vmatpush.msrb.mxu2 %v1002_v38 }
 0x156   :  { %422 = vmatpush.msrb.mxu1 %v1121_v49  ;;  %446 = vmatpush.msrb.mxu2 %v1018_v41 }
 0x1b4   :  { %v240_v59 = vpop.f32.mrf.mxu1 }
 0x1ba   :  { %v264_v16 = vpop.f32.mrf.mxu2 }
 0x1bb   :  { %v267_v19 = vadd.f32 %v264_v16, %v78_v12 }
 0x1bd   :  { %738 = vtanh.f32 %v267_v19 }
 0x1c3   :  { %v739_v22 = vpop.eup %738 }
 0x1c4   :  { %285 = vmatmul.f32.vlgmr.msrb.gmra.mxu3 %v739_v22  ;;  %309 = vmatmul.f32.vlgmr.msrb.gmra.mxu0 %v739_v22 }
 0x1c5   :  { %453 = vmatpush.msrb.mxu3 %v877_v14  ;;  %477 = vmatpush.msrb.mxu0 %v816_v2  ;;  %v80_v2 = vpop.f32.mrf.mxu0 }
 0x1c7   :  { %454 = vmatpush.msrb.mxu3 %v882_v15  ;;  %478 = vmatpush.msrb.mxu0 %v822_v3 }
 0x1c9   :  { %455 = vmatpush.msrb.mxu3 %v898_v18  ;;  %479 = vmatpush.msrb.mxu0 %v830_v5 }
 0x1cb   :  { %456 = vmatpush.msrb.mxu3 %v914_v21  ;;  %480 = vmatpush.msrb.mxu0 %v840_v7 }
 0x1cd   :  { %457 = vmatpush.msrb.mxu3 %v930_v24  ;;  %481 = vmatpush.msrb.mxu0 %v850_v9  ;;  %v83_v3 = vpop.f32.mrf.mxu0 }
 0x1cf   :  { %458 = vmatpush.msrb.mxu3 %v946_v27  ;;  %482 = vmatpush.msrb.mxu0 %v860_v11  ;;  %v81_v11 = vadd.f32 %v1153_v51, %v80_v2 }
 0x1d1   :  { %459 = vmatpush.msrb.mxu3 %v962_v30  ;;  %483 = vmatpush.msrb.mxu0 %v870_v13 }
 0x1d3   :  { %460 = vmatpush.msrb.mxu3 %v978_v33  ;;  %484 = vmatpush.msrb.mxu0 %v890_v17 }
 0x1d5   :  { %461 = vmatpush.msrb.mxu3 %v994_v36  ;;  %485 = vmatpush.msrb.mxu0 %v906_v20  ;;  %v86_v5 = vpop.f32.mrf.mxu0 }
 0x1d7   :  { %462 = vmatpush.msrb.mxu3 %v1010_v39  ;;  %486 = vmatpush.msrb.mxu0 %v922_v23  ;;  %v87_v23 = vadd.f32 %v1153_v51, %v86_v5 }
 0x1d9   :  { %463 = vmatpush.msrb.mxu3 %v1085_v44  ;;  %487 = vmatpush.msrb.mxu0 %v938_v26 }
 0x1db   :  { %464 = vmatpush.msrb.mxu3 %v1092_v45  ;;  %488 = vmatpush.msrb.mxu0 %v954_v29  ;;  %v1327_v29 = vld [vmem:[%s1558_s5 + $0x68] sm:$0xff] }
 0x1dd   :  { %465 = vmatpush.msrb.mxu3 %v1100_v46  ;;  %489 = vmatpush.msrb.mxu0 %v970_v32  ;;  %v1289_v7 = vpop.f32.mrf.mxu0  ;;  %v1354_v32 = vld [vmem:[%s1558_s5 + $0x50] sm:$0xff] }
 0x1df   :  { %466 = vmatpush.msrb.mxu3 %v1107_v47  ;;  %490 = vmatpush.msrb.mxu0 %v986_v35  ;;  %v1381_v35 = vld [vmem:[%s1558_s5 + $0x38] sm:$0xff] }
 0x1e1   :  { %467 = vmatpush.msrb.mxu3 %v1113_v48  ;;  %491 = vmatpush.msrb.mxu0 %v1002_v38  ;;  %v90_v38 = vadd.f32 %v1153_v51, %v1289_v7 }
 0x1e3   :  { %468 = vmatpush.msrb.mxu3 %v1121_v49  ;;  %492 = vmatpush.msrb.mxu0 %v1018_v41 }
 0x1e5   :  { %v1291_v9 = vpop.f32.mrf.mxu0 }
 0x241   :  { %v310_v13 = vpop.f32.mrf.mxu0 }
 0x242   :  { %v313_v17 = vadd.f32 %v310_v13, %v81_v11 }
 0x244   :  { %740 = vtanh.f32 %v313_v17 }
 0x247   :  { %v286_v56 = vpop.f32.mrf.mxu3 }
 0x24a   :  { %v741_v20 = vpop.eup %740 }
 0x24b   :  { %331 = vmatmul.f32.vlgmr.msra.gmra.mxu1 %v741_v20  ;;  %355 = vmatmul.f32.vlgmr.msra.gmra.mxu2 %v741_v20 }
 0x24c   :  { %499 = vmatpush.msra.mxu1 %v877_v14  ;;  %v84_v14 = vadd.f32 %v1153_v51, %v83_v3 }
 0x24e   :  { %500 = vmatpush.msra.mxu1 %v882_v15 }
 0x250   :  { %501 = vmatpush.msra.mxu1 %v898_v18 }
 0x252   :  { %502 = vmatpush.msra.mxu1 %v914_v21 }
 0x254   :  { %503 = vmatpush.msra.mxu1 %v930_v24 }
 0x256   :  { %504 = vmatpush.msra.mxu1 %v946_v27  ;;  %v1315_v27 = vld [vmem:[%s1558_s5 + $0x78] sm:$0xff] }
 0x257   :  { %522 = vmatpush.msra.mxu2 %v1315_v27 }
 0x258   :  { %505 = vmatpush.msra.mxu1 %v962_v30  ;;  %v1336_v30 = vld [vmem:[%s1558_s5 + $0x60] sm:$0xff] }
 0x259   :  { %523 = vmatpush.msra.mxu2 %v1320_v28 }
 0x25a   :  { %506 = vmatpush.msra.mxu1 %v978_v33  ;;  %v1363_v33 = vld [vmem:[%s1558_s5 + $0x48] sm:$0xff] }
 0x25b   :  { %524 = vmatpush.msra.mxu2 %v1327_v29 }
 0x25c   :  { %507 = vmatpush.msra.mxu1 %v994_v36  ;;  %v1390_v36 = vld [vmem:[%s1558_s5 + $0x30] sm:$0xff] }
 0x25d   :  { %525 = vmatpush.msra.mxu2 %v1336_v30 }
 0x25e   :  { %508 = vmatpush.msra.mxu1 %v1010_v39 }
 0x25f   :  { %526 = vmatpush.msra.mxu2 %v1345_v31 }
 0x260   :  { %509 = vmatpush.msra.mxu1 %v1085_v44  ;;  %v1431_v44 = vld [vmem:[%s1558_s5 + $0x10] sm:$0xff] }
 0x261   :  { %527 = vmatpush.msra.mxu2 %v1354_v32 }
 0x262   :  { %510 = vmatpush.msra.mxu1 %v1092_v45  ;;  %v1441_v45 = vld [vmem:[%s1558_s5 + $0x8] sm:$0xff] }
 0x263   :  { %528 = vmatpush.msra.mxu2 %v1363_v33 }
 0x264   :  { %511 = vmatpush.msra.mxu1 %v1100_v46  ;;  %v1449_v46 = vld [vmem:[%s1558_s5] sm:$0xff] }
 0x265   :  { %529 = vmatpush.msra.mxu2 %v1372_v34 }
 0x266   :  { %512 = vmatpush.msra.mxu1 %v1107_v47  ;;  %v93_v47 = vadd.f32 %v1153_v51, %v1291_v9  ;;  %v733_v51 = vld [vmem:[%s1557_s6] ss:$0 sm:$0xff] }
 0x267   :  { %530 = vmatpush.msra.mxu2 %v1381_v35  ;;  %v196_v52 = vadd.f32 %v733_v51, %v1254_v8  ;;  %v241_v60 = vadd.f32 %v733_v51, %v240_v59  ;;  %v287_v0 = vadd.f32 %v733_v51, %v286_v56 }
 0x268   :  { %513 = vmatpush.msra.mxu1 %v1113_v48 }
 0x269   :  { %531 = vmatpush.msra.mxu2 %v1390_v36 }
 0x26a   :  { %514 = vmatpush.msra.mxu1 %v1121_v49 }
 0x26b   :  { %532 = vmatpush.msra.mxu2 %v1399_v37 }
 0x26d   :  { %533 = vmatpush.msra.mxu2 %v1416_v42 }
 0x26f   :  { %534 = vmatpush.msra.mxu2 %v1423_v43 }
 0x271   :  { %535 = vmatpush.msra.mxu2 %v1431_v44 }
 0x273   :  { %536 = vmatpush.msra.mxu2 %v1441_v45 }
 0x275   :  { %537 = vmatpush.msra.mxu2 %v1449_v46 }
 0x2c8   :  { %v332_v8 = vpop.f32.mrf.mxu1 }
 0x2c9   :  { %v333_v16 = vadd.f32 %v733_v51, %v332_v8 }
 0x2ce   :  { %v356_v15 = vpop.f32.mrf.mxu2 }
 0x2cf   :  { %v359_v18 = vadd.f32 %v356_v15, %v84_v14 }
 0x2d1   :  { %742 = vtanh.f32 %v359_v18 }
 0x2d7   :  { %v743_v21 = vpop.eup %742 }
 0x2d8   :  { %377 = vmatmul.f32.vlgmr.msra.gmra.mxu3 %v743_v21  ;;  %401 = vmatmul.f32.vlgmr.msra.gmra.mxu0 %v743_v21 }
 0x2d9   :  { %546 = vmatpush.msra.mxu3 %v1315_v27  ;;  %571 = vmatpush.msra.mxu0 %v1315_v27 }
 0x2db   :  { %547 = vmatpush.msra.mxu3 %v1320_v28  ;;  %572 = vmatpush.msra.mxu0 %v1320_v28 }
 0x2dd   :  { %548 = vmatpush.msra.mxu3 %v1327_v29  ;;  %573 = vmatpush.msra.mxu0 %v1327_v29 }
 0x2df   :  { %549 = vmatpush.msra.mxu3 %v1336_v30  ;;  %574 = vmatpush.msra.mxu0 %v1336_v30 }
 0x2e1   :  { %550 = vmatpush.msra.mxu3 %v1345_v31  ;;  %575 = vmatpush.msra.mxu0 %v1345_v31 }
 0x2e3   :  { %551 = vmatpush.msra.mxu3 %v1354_v32  ;;  %576 = vmatpush.msra.mxu0 %v1354_v32 }
 0x2e5   :  { %552 = vmatpush.msra.mxu3 %v1363_v33  ;;  %577 = vmatpush.msra.mxu0 %v1363_v33 }
 0x2e7   :  { %553 = vmatpush.msra.mxu3 %v1372_v34  ;;  %578 = vmatpush.msra.mxu0 %v1372_v34 }
 0x2e9   :  { %554 = vmatpush.msra.mxu3 %v1381_v35  ;;  %579 = vmatpush.msra.mxu0 %v1381_v35 }
 0x2eb   :  { %555 = vmatpush.msra.mxu3 %v1390_v36  ;;  %580 = vmatpush.msra.mxu0 %v1390_v36 }
 0x2ed   :  { %556 = vmatpush.msra.mxu3 %v1399_v37  ;;  %581 = vmatpush.msra.mxu0 %v1399_v37 }
 0x2ef   :  { %557 = vmatpush.msra.mxu3 %v1416_v42  ;;  %582 = vmatpush.msra.mxu0 %v1416_v42 }
 0x2f1   :  { %558 = vmatpush.msra.mxu3 %v1423_v43  ;;  %583 = vmatpush.msra.mxu0 %v1423_v43 }
 0x2f3   :  { %559 = vmatpush.msra.mxu3 %v1431_v44  ;;  %584 = vmatpush.msra.mxu0 %v1431_v44 }
 0x2f5   :  { %560 = vmatpush.msra.mxu3 %v1441_v45  ;;  %585 = vmatpush.msra.mxu0 %v1441_v45 }
 0x2f7   :  { %561 = vmatpush.msra.mxu3 %v1449_v46  ;;  %586 = vmatpush.msra.mxu0 %v1449_v46 }
 0x355   :  { %v402_v24 = vpop.f32.mrf.mxu0 }
 0x356   :  { %v405_v25 = vadd.f32 %v402_v24, %v87_v23 }
 0x358   :  { %744 = vtanh.f32 %v405_v25 }
 0x35b   :  { %v378_v57 = vpop.f32.mrf.mxu3 }
 0x35c   :  { %v379_v3 = vadd.f32 %v733_v51, %v378_v57 }
 0x35e   :  { %v745_v26 = vpop.eup %744 }
 0x35f   :  { %423 = vmatmul.f32.vlgmr.msrb.gmra.mxu1 %v745_v26  ;;  %447 = vmatmul.f32.vlgmr.msrb.gmra.mxu2 %v745_v26 }
 0x360   :  { %596 = vmatpush.msrb.mxu1 %v1315_v27  ;;  %621 = vmatpush.msrb.mxu2 %v1315_v27 }
 0x362   :  { %597 = vmatpush.msrb.mxu1 %v1320_v28  ;;  %622 = vmatpush.msrb.mxu2 %v1320_v28 }
 0x364   :  { %598 = vmatpush.msrb.mxu1 %v1327_v29  ;;  %623 = vmatpush.msrb.mxu2 %v1327_v29 }
 0x366   :  { %599 = vmatpush.msrb.mxu1 %v1336_v30  ;;  %624 = vmatpush.msrb.mxu2 %v1336_v30 }
 0x368   :  { %600 = vmatpush.msrb.mxu1 %v1345_v31  ;;  %625 = vmatpush.msrb.mxu2 %v1345_v31 }
 0x36a   :  { %601 = vmatpush.msrb.mxu1 %v1354_v32  ;;  %626 = vmatpush.msrb.mxu2 %v1354_v32 }
 0x36c   :  { %602 = vmatpush.msrb.mxu1 %v1363_v33  ;;  %627 = vmatpush.msrb.mxu2 %v1363_v33 }
 0x36e   :  { %603 = vmatpush.msrb.mxu1 %v1372_v34  ;;  %628 = vmatpush.msrb.mxu2 %v1372_v34 }
 0x370   :  { %604 = vmatpush.msrb.mxu1 %v1381_v35  ;;  %629 = vmatpush.msrb.mxu2 %v1381_v35 }
 0x372   :  { %605 = vmatpush.msrb.mxu1 %v1390_v36  ;;  %630 = vmatpush.msrb.mxu2 %v1390_v36 }
 0x374   :  { %606 = vmatpush.msrb.mxu1 %v1399_v37  ;;  %631 = vmatpush.msrb.mxu2 %v1399_v37 }
 0x376   :  { %607 = vmatpush.msrb.mxu1 %v1416_v42  ;;  %632 = vmatpush.msrb.mxu2 %v1416_v42 }
 0x378   :  { %608 = vmatpush.msrb.mxu1 %v1423_v43  ;;  %633 = vmatpush.msrb.mxu2 %v1423_v43 }
 0x37a   :  { %609 = vmatpush.msrb.mxu1 %v1431_v44  ;;  %634 = vmatpush.msrb.mxu2 %v1431_v44 }
 0x37c   :  { %610 = vmatpush.msrb.mxu1 %v1441_v45  ;;  %635 = vmatpush.msrb.mxu2 %v1441_v45 }
 0x37e   :  { %611 = vmatpush.msrb.mxu1 %v1449_v46  ;;  %636 = vmatpush.msrb.mxu2 %v1449_v46 }
 0x3dc   :  { %v424_v10 = vpop.f32.mrf.mxu1 }
 0x3dd   :  { %v425_v11 = vadd.f32 %v733_v51, %v424_v10 }
 0x3e2   :  { %v448_v39 = vpop.f32.mrf.mxu2 }
 0x3e3   :  { %v451_v40 = vadd.f32 %v448_v39, %v90_v38 }
 0x3e5   :  { %746 = vtanh.f32 %v451_v40 }
 0x3eb   :  { %v747_v41 = vpop.eup %746 }
 0x3ec   :  { %469 = vmatmul.f32.vlgmr.msrb.gmra.mxu3 %v747_v41  ;;  %493 = vmatmul.f32.vlgmr.msrb.gmra.mxu0 %v747_v41 }
 0x3ed   :  { %646 = vmatpush.msrb.mxu3 %v1315_v27  ;;  %671 = vmatpush.msrb.mxu0 %v1315_v27 }
 0x3ef   :  { %647 = vmatpush.msrb.mxu3 %v1320_v28  ;;  %672 = vmatpush.msrb.mxu0 %v1320_v28 }
 0x3f1   :  { %648 = vmatpush.msrb.mxu3 %v1327_v29  ;;  %673 = vmatpush.msrb.mxu0 %v1327_v29 }
 0x3f3   :  { %649 = vmatpush.msrb.mxu3 %v1336_v30  ;;  %674 = vmatpush.msrb.mxu0 %v1336_v30 }
 0x3f5   :  { %650 = vmatpush.msrb.mxu3 %v1345_v31  ;;  %675 = vmatpush.msrb.mxu0 %v1345_v31 }
 0x3f7   :  { %651 = vmatpush.msrb.mxu3 %v1354_v32  ;;  %676 = vmatpush.msrb.mxu0 %v1354_v32 }
 0x3f9   :  { %652 = vmatpush.msrb.mxu3 %v1363_v33  ;;  %677 = vmatpush.msrb.mxu0 %v1363_v33 }
 0x3fb   :  { %653 = vmatpush.msrb.mxu3 %v1372_v34  ;;  %678 = vmatpush.msrb.mxu0 %v1372_v34 }
 0x3fd   :  { %654 = vmatpush.msrb.mxu3 %v1381_v35  ;;  %679 = vmatpush.msrb.mxu0 %v1381_v35 }
 0x3ff   :  { %655 = vmatpush.msrb.mxu3 %v1390_v36  ;;  %680 = vmatpush.msrb.mxu0 %v1390_v36 }
 0x401   :  { %656 = vmatpush.msrb.mxu3 %v1399_v37  ;;  %681 = vmatpush.msrb.mxu0 %v1399_v37 }
 0x403   :  { %657 = vmatpush.msrb.mxu3 %v1416_v42  ;;  %682 = vmatpush.msrb.mxu0 %v1416_v42 }
 0x405   :  { %658 = vmatpush.msrb.mxu3 %v1423_v43  ;;  %683 = vmatpush.msrb.mxu0 %v1423_v43 }
 0x407   :  { %659 = vmatpush.msrb.mxu3 %v1431_v44  ;;  %684 = vmatpush.msrb.mxu0 %v1431_v44 }
 0x409   :  { %660 = vmatpush.msrb.mxu3 %v1441_v45  ;;  %685 = vmatpush.msrb.mxu0 %v1441_v45 }
 0x40b   :  { %661 = vmatpush.msrb.mxu3 %v1449_v46  ;;  %686 = vmatpush.msrb.mxu0 %v1449_v46 }
 0x469   :  { %v494_v48 = vpop.f32.mrf.mxu0 }
 0x46a   :  { %v497_v49 = vadd.f32 %v494_v48, %v93_v47 }
 0x46c   :  { %748 = vtanh.f32 %v497_v49 }
 0x46f   :  { %v470_v58 = vpop.f32.mrf.mxu3 }
 0x470   :  { %v471_v14 = vadd.f32 %v733_v51, %v470_v58 }
 0x472   :  { %v749_v50 = vpop.eup %748 }
 0x473   :  { %515 = vmatmul.f32.vlgmr.msra.gmra.mxu1 %v749_v50  ;;  %538 = vmatmul.f32.vlgmr.msra.gmra.mxu2 %v749_v50 }
 0x474   :  { %696 = vmatpush.msra.mxu1 %v1315_v27 }
 0x476   :  { %697 = vmatpush.msra.mxu1 %v1320_v28 }
 0x478   :  { %698 = vmatpush.msra.mxu1 %v1327_v29 }
 0x47a   :  { %699 = vmatpush.msra.mxu1 %v1336_v30 }
 0x47c   :  { %700 = vmatpush.msra.mxu1 %v1345_v31 }
 0x47e   :  { %701 = vmatpush.msra.mxu1 %v1354_v32 }
 0x480   :  { %702 = vmatpush.msra.mxu1 %v1363_v33 }
 0x482   :  { %703 = vmatpush.msra.mxu1 %v1372_v34 }
 0x484   :  { %704 = vmatpush.msra.mxu1 %v1381_v35 }
 0x486   :  { %705 = vmatpush.msra.mxu1 %v1390_v36 }
 0x488   :  { %706 = vmatpush.msra.mxu1 %v1399_v37 }
 0x48a   :  { %707 = vmatpush.msra.mxu1 %v1416_v42 }
 0x48c   :  { %708 = vmatpush.msra.mxu1 %v1423_v43 }
 0x48e   :  { %709 = vmatpush.msra.mxu1 %v1431_v44 }
 0x490   :  { %710 = vmatpush.msra.mxu1 %v1441_v45 }
 0x492   :  { %711 = vmatpush.msra.mxu1 %v1449_v46 }
 0x4f0   :  { %v516_v12 = vpop.f32.mrf.mxu1 }
 0x4f1   :  { %v517_v23 = vadd.f32 %v733_v51, %v516_v12 }
 0x4f6   :  { %v539_v53 = vpop.f32.mrf.mxu2 }
 0x4f7   :  { %v542_v54 = vadd.f32 %v539_v53, %v196_v52 }
 0x4f9   :  { %750 = vtanh.f32 %v542_v54 }
 0x4ff   :  { %v751_v55 = vpop.eup %750 }
 0x500   :  { %544 = vst [vmem:[%s1559_s7] sm:$0xff] %v751_v55  ;;  %562 = vmatmul.f32.vlgmr.msra.gmra.mxu3 %v751_v55 }
 0x583   :  { %v563_v61 = vpop.f32.mrf.mxu3 }
 0x584   :  { %v566_v62 = vadd.f32 %v563_v61, %v241_v60 }
 0x586   :  { %752 = vtanh.f32 %v566_v62 }
 0x58c   :  { %v753_v63 = vpop.eup %752 }
 0x58d   :  { %724 = vst [vmem:[%s1559_s7 + $0x8] sm:$0xff] %v753_v63  ;;  %587 = vmatmul.f32.vlgmr.msra.gmra.mxu0 %v753_v63 }
 0x60a   :  { %v588_v1 = vpop.f32.mrf.mxu0 }
 0x60b   :  { %v591_v4 = vadd.f32 %v588_v1, %v287_v0 }
 0x60d   :  { %754 = vtanh.f32 %v591_v4 }
 0x613   :  { %v755_v6 = vpop.eup %754 }
 0x614   :  { %725 = vst [vmem:[%s1559_s7 + $0x10] sm:$0xff] %v755_v6  ;;  %612 = vmatmul.f32.vlgmr.msrb.gmra.mxu1 %v755_v6 }
 0x691   :  { %v613_v19 = vpop.f32.mrf.mxu1 }
 0x692   :  { %v616_v22 = vadd.f32 %v613_v19, %v333_v16 }
 0x694   :  { %756 = vtanh.f32 %v616_v22 }
 0x69a   :  { %v757_v2 = vpop.eup %756 }
 0x69b   :  { %726 = vst [vmem:[%s1559_s7 + $0x18] sm:$0xff] %v757_v2  ;;  %637 = vmatmul.f32.vlgmr.msrb.gmra.mxu2 %v757_v2 }
 0x71e   :  { %v638_v5 = vpop.f32.mrf.mxu2 }
 0x71f   :  { %v641_v7 = vadd.f32 %v638_v5, %v379_v3 }
 0x721   :  { %758 = vtanh.f32 %v641_v7 }
 0x727   :  { %v759_v9 = vpop.eup %758 }
 0x728   :  { %727 = vst [vmem:[%s1559_s7 + $0x20] sm:$0xff] %v759_v9  ;;  %662 = vmatmul.f32.vlgmr.msrb.gmra.mxu3 %v759_v9 }
 0x7ab   :  { %v663_v13 = vpop.f32.mrf.mxu3 }
 0x7ac   :  { %v666_v17 = vadd.f32 %v663_v13, %v425_v11 }
 0x7ae   :  { %760 = vtanh.f32 %v666_v17 }
 0x7b4   :  { %v761_v20 = vpop.eup %760 }
 0x7b5   :  { %728 = vst [vmem:[%s1559_s7 + $0x28] sm:$0xff] %v761_v20  ;;  %687 = vmatmul.f32.vlgmr.msrb.gmra.mxu0 %v761_v20 }
 0x832   :  { %v688_v15 = vpop.f32.mrf.mxu0 }
 0x833   :  { %v691_v18 = vadd.f32 %v688_v15, %v471_v14 }
 0x835   :  { %762 = vtanh.f32 %v691_v18 }
 0x83b   :  { %v763_v21 = vpop.eup %762 }
 0x83c   :  { %729 = vst [vmem:[%s1559_s7 + $0x30] sm:$0xff] %v763_v21  ;;  %712 = vmatmul.f32.vlgmr.msra.gmra.mxu1 %v763_v21 }
 0x8b9   :  { %v713_v24 = vpop.f32.mrf.mxu1 }
 0x8ba   :  { %v716_v25 = vadd.f32 %v713_v24, %v517_v23 }
 0x8bc   :  { %764 = vtanh.f32 %v716_v25 }
 0x8c2   :  { %v765_v26 = vpop.eup %764 }
 0x8c3   :  { %730 = vst [vmem:[%s1559_s7 + $0x38] sm:$0xff] %v765_v26 }

</bundles_post_ra>
